<compile_context>
chip_gen: v7x
topology: tpu7x:2x2x1
jax: 0.10.0
libtpu: 0.0.40
codegen_flags: <defaults>
</compile_context>

<pallas_src>
import functools

import jax
import jax.numpy as jnp
from jax.experimental import pallas as pl
from jax.experimental.pallas import tpu as pltpu

LANE = 128          # TPU vreg lane width
DEFAULT_TB = 256    # batch tile (multiple of 8/16 sublane packing)
NEG_BIG = -1.0e30   # mask value for padded logit lanes


def _round_up(n, m):
    return ((n + m - 1) // m) * m


def _mlp_kernel(n_layers, out_valid, *refs):
    """Fused MLP kernel over one batch tile.

    refs layout: (x_ref, W0, b0, W1, b1, ..., W_{L-1}, b_{L-1}, out_ref)
    Weights are bf16 (lane-dense, zero padded); biases f32 (1, out_p).
    """
    x_ref = refs[0]
    param_refs = refs[1:-1]
    o_ref = refs[-1]

    h = x_ref[...].astype(jnp.float32)          # (TB, in_p), f32 tail math
    for i in range(n_layers):
        w = param_refs[2 * i][...]              # bf16 (in_p, out_p)
        b = param_refs[2 * i + 1][...]          # f32  (1, out_p)
        # bf16 MXU operands, f32 accumulation.
        h = jnp.dot(h.astype(jnp.bfloat16), w,
                    preferred_element_type=jnp.float32) + b
        if i != n_layers - 1:
            h = jnp.maximum(h, 0.0)             # ReLU (dropout == identity, eval mode)

    # log_softmax over the feature axis (torch dim=1), numerically stable.
    # Padded lanes (>= out_valid) are masked so they contribute exp(.) == 0.
    lane = jax.lax.broadcasted_iota(jnp.int32, h.shape, dimension=1)
    h = jnp.where(lane < out_valid, h, NEG_BIG)
    m = jnp.max(h, axis=-1, keepdims=True)
    shifted = h - m
    lse = jnp.log(jnp.sum(jnp.exp(shifted), axis=-1, keepdims=True))
    o_ref[...] = (shifted - lse).astype(o_ref.dtype)


def init_network_params(key, input_size, output_size, hidden_sizes):
    """Unpadded f32 params; weights (in, out) (transpose of torch Linear.weight)."""
    if len(hidden_sizes) > 0:
        dims = [input_size] + list(hidden_sizes) + [output_size]
    else:
        dims = [input_size, output_size]
    params = []
    for n_in, n_out in zip(dims[:-1], dims[1:]):
        key, kw, kb = jax.random.split(key, 3)
        bound = 1.0 / jnp.sqrt(n_in)  # torch.nn.Linear default U(-1/sqrt(in), 1/sqrt(in))
        w = jax.random.uniform(kw, (n_in, n_out), jnp.float32, -bound, bound)
        b = jax.random.uniform(kb, (n_out,), jnp.float32, -bound, bound)
        params.append((w, b))
    return params


def prepare_params(params):
    """Pad all feature dims to multiples of 128; weights -> bf16, biases -> f32 (1, out_p)."""
    flat = []
    for w, b in params:
        n_in, n_out = w.shape
        in_p = _round_up(n_in, LANE)
        out_p = _round_up(n_out, LANE)
        w_p = jnp.zeros((in_p, out_p), jnp.bfloat16)
        w_p = w_p.at[:n_in, :n_out].set(w.astype(jnp.bfloat16))
        b_p = jnp.zeros((1, out_p), jnp.float32)
        b_p = b_p.at[0, :n_out].set(b.astype(jnp.float32))
        flat.extend([w_p, b_p])
    return tuple(flat)


@functools.partial(jax.jit, static_argnames=("n_layers", "out_valid", "tb"))
def _run_pallas_mlp(x_padded, flat_params, n_layers, out_valid, tb):
    batch_p, in_p = x_padded.shape
    out_p = flat_params[-1].shape[-1]
    grid = (batch_p // tb,)

    # x / out tiled over batch; weights & biases resident (constant index_map).
    in_specs = [pl.BlockSpec((tb, in_p), lambda i: (i, 0))]
    for li in range(n_layers):
        w = flat_params[2 * li]
        b = flat_params[2 * li + 1]
        in_specs.append(pl.BlockSpec(tuple(w.shape), lambda i: (0, 0)))
        in_specs.append(pl.BlockSpec(tuple(b.shape), lambda i: (0, 0)))
    out_specs = pl.BlockSpec((tb, out_p), lambda i: (i, 0))

    # Cost estimate (advisory).
    flops = 0
    prev = in_p
    max_dim = in_p
    for li in range(n_layers):
        o = flat_params[2 * li].shape[1]
        flops += 2 * batch_p * prev * o
        max_dim = max(max_dim, o)
        prev = o
    transcendentals = batch_p * out_p
    param_bytes = sum(int(p.size) * p.dtype.itemsize for p in flat_params)
    bytes_accessed = (int(x_padded.size) * x_padded.dtype.itemsize
                      + param_bytes + batch_p * out_p * 4)

    # VMEM budget: resident weights + double-buffered x/out tiles + f32 intermediates,
    # with headroom; capped at 64 MiB so it also fits v7x.
    tile_bytes = 2 * (tb * in_p * 4 + tb * out_p * 4)
    act_bytes = 4 * tb * max_dim * 4
    vmem_limit = int(min(64 * 2**20,
                         max(32 * 2**20, 2 * (param_bytes + tile_bytes + act_bytes))))

    kernel = functools.partial(_mlp_kernel, n_layers, out_valid)
    return pl.pallas_call(
        kernel,
        out_shape=jax.ShapeDtypeStruct((batch_p, out_p), jnp.float32),
        grid=grid,
        in_specs=in_specs,
        out_specs=out_specs,
        compiler_params=pltpu.CompilerParams(
            dimension_semantics=("parallel",),
            vmem_limit_bytes=vmem_limit),
        cost_estimate=pl.CostEstimate(flops=flops,
                                      transcendentals=transcendentals,
                                      bytes_accessed=bytes_accessed),
    )(x_padded, *flat_params)


def network_forward(x, params, tb=DEFAULT_TB):
    """Pallas-backed forward pass equivalent to Network.forward (eval mode)."""
    batch, in_dim = x.shape
    out_dim = params[-1][0].shape[1]
    flat = prepare_params(params)
    in_p = flat[0].shape[0]
    batch_p = _round_up(batch, tb)

    x_p = jnp.zeros((batch_p, in_p), jnp.float32)
    x_p = x_p.at[:batch, :in_dim].set(x.astype(jnp.float32))

    out = _run_pallas_mlp(x_p, flat, n_layers=len(params), out_valid=out_dim, tb=tb)
    return out[:batch, :out_dim]


def _reference_forward(x, params):
    """Pure-JAX reference mirroring the kernel's bf16-matmul / f32-tail arithmetic."""
    h = x.astype(jnp.float32)
    for i, (w, b) in enumerate(params):
        h = jnp.dot(h.astype(jnp.bfloat16), w.astype(jnp.bfloat16),
                    preferred_element_type=jnp.float32) + b
        if i != len(params) - 1:
            h = jnp.maximum(h, 0.0)
    return jax.nn.log_softmax(h, axis=1)


if __name__ == "__main__":
    # Small synthetic configuration consistent with the module's __init__.
    batch = 8
    input_size = 32
    hidden_sizes = [64, 64]
    output_size = 16

    key = jax.random.PRNGKey(0)
    key, kx = jax.random.split(key)
    x = jax.random.normal(kx, (batch, input_size), dtype=jnp.float32)

    params = init_network_params(key, input_size, output_size, hidden_sizes)

    out = network_forward(x, params)
    out = jax.block_until_ready(out)

    ref = _reference_forward(x, params)
    assert out.shape == (batch, output_size)
    assert jnp.allclose(out, ref, atol=1e-3, rtol=1e-3), "Pallas kernel mismatch vs reference"

    print("KERNEL_OK")
</pallas_src>

<mosaic_0001>
module attributes {stable_mosaic.version = 11 : i64} {
  func.func @_mlp_kernel(%arg0: i32, %arg1: memref<256x128xf32, #tpu.memory_space<vmem>>, %arg2: memref<128x128xbf16, #tpu.memory_space<vmem>>, %arg3: memref<1x128xf32, #tpu.memory_space<vmem>>, %arg4: memref<128x128xbf16, #tpu.memory_space<vmem>>, %arg5: memref<1x128xf32, #tpu.memory_space<vmem>>, %arg6: memref<128x128xbf16, #tpu.memory_space<vmem>>, %arg7: memref<1x128xf32, #tpu.memory_space<vmem>>, %arg8: memref<256x128xf32, #tpu.memory_space<vmem>>) attributes {dimension_semantics = [#tpu.dimension_semantics<parallel>], iteration_bounds = array<i64: 1>, scalar_prefetch = 0 : i64, scratch_operands = 0 : i64, tpu.core_type = #tpu.core_type<tc>, window_params = [{transform_indices = @transform_0, window_bounds = array<i64: 256, 128>}, {pipeline_mode = #tpu.pipeline_mode<synchronous>, transform_indices = @transform_1, window_bounds = array<i64: 128, 128>}, {pipeline_mode = #tpu.pipeline_mode<synchronous>, transform_indices = @transform_2, window_bounds = array<i64: 1, 128>}, {pipeline_mode = #tpu.pipeline_mode<synchronous>, transform_indices = @transform_3, window_bounds = array<i64: 128, 128>}, {pipeline_mode = #tpu.pipeline_mode<synchronous>, transform_indices = @transform_4, window_bounds = array<i64: 1, 128>}, {pipeline_mode = #tpu.pipeline_mode<synchronous>, transform_indices = @transform_5, window_bounds = array<i64: 128, 128>}, {pipeline_mode = #tpu.pipeline_mode<synchronous>, transform_indices = @transform_6, window_bounds = array<i64: 1, 128>}, {transform_indices = @transform_7, window_bounds = array<i64: 256, 128>}]} {
    %c0 = arith.constant 0 : index
    %c0_0 = arith.constant 0 : index
    %0 = vector.load %arg1[%c0, %c0_0] : memref<256x128xf32, #tpu.memory_space<vmem>>, vector<256x128xf32>
    %c0_1 = arith.constant 0 : index
    %c0_2 = arith.constant 0 : index
    %1 = vector.load %arg2[%c0_1, %c0_2] : memref<128x128xbf16, #tpu.memory_space<vmem>>, vector<128x128xbf16>
    %c0_3 = arith.constant 0 : index
    %c0_4 = arith.constant 0 : index
    %2 = vector.load %arg3[%c0_3, %c0_4] : memref<1x128xf32, #tpu.memory_space<vmem>>, vector<1x128xf32>
    %3 = arith.truncf %0 : vector<256x128xf32> to vector<256x128xbf16>
    %cst = arith.constant dense<0.000000e+00> : vector<256x128xf32>
    %4 = tpu.matmul %3, %1, %cst {dimension_numbers = #tpu.dot_dimension_numbers<[1], [0], [0], [1], [0, 0, 1, 1], [], []>} : vector<256x128xbf16>, vector<128x128xbf16>, vector<256x128xf32> -> vector<256x128xf32>
    %5 = vector.broadcast %2 : vector<1x128xf32> to vector<256x128xf32>
    %6 = arith.addf %4, %5 : vector<256x128xf32>
    %cst_5 = arith.constant 0.000000e+00 : f32
    %7 = vector.broadcast %cst_5 : f32 to vector<256x128xf32>
    %8 = arith.maximumf %6, %7 : vector<256x128xf32>
    %c0_6 = arith.constant 0 : index
    %c0_7 = arith.constant 0 : index
    %9 = vector.load %arg4[%c0_6, %c0_7] : memref<128x128xbf16, #tpu.memory_space<vmem>>, vector<128x128xbf16>
    %c0_8 = arith.constant 0 : index
    %c0_9 = arith.constant 0 : index
    %10 = vector.load %arg5[%c0_8, %c0_9] : memref<1x128xf32, #tpu.memory_space<vmem>>, vector<1x128xf32>
    %11 = arith.truncf %8 : vector<256x128xf32> to vector<256x128xbf16>
    %cst_10 = arith.constant dense<0.000000e+00> : vector<256x128xf32>
    %12 = tpu.matmul %11, %9, %cst_10 {dimension_numbers = #tpu.dot_dimension_numbers<[1], [0], [0], [1], [0, 0, 1, 1], [], []>} : vector<256x128xbf16>, vector<128x128xbf16>, vector<256x128xf32> -> vector<256x128xf32>
    %13 = vector.broadcast %10 : vector<1x128xf32> to vector<256x128xf32>
    %14 = arith.addf %12, %13 : vector<256x128xf32>
    %cst_11 = arith.constant 0.000000e+00 : f32
    %15 = vector.broadcast %cst_11 : f32 to vector<256x128xf32>
    %16 = arith.maximumf %14, %15 : vector<256x128xf32>
    %c0_12 = arith.constant 0 : index
    %c0_13 = arith.constant 0 : index
    %17 = vector.load %arg6[%c0_12, %c0_13] : memref<128x128xbf16, #tpu.memory_space<vmem>>, vector<128x128xbf16>
    %c0_14 = arith.constant 0 : index
    %c0_15 = arith.constant 0 : index
    %18 = vector.load %arg7[%c0_14, %c0_15] : memref<1x128xf32, #tpu.memory_space<vmem>>, vector<1x128xf32>
    %19 = arith.truncf %16 : vector<256x128xf32> to vector<256x128xbf16>
    %cst_16 = arith.constant dense<0.000000e+00> : vector<256x128xf32>
    %20 = tpu.matmul %19, %17, %cst_16 {dimension_numbers = #tpu.dot_dimension_numbers<[1], [0], [0], [1], [0, 0, 1, 1], [], []>} : vector<256x128xbf16>, vector<128x128xbf16>, vector<256x128xf32> -> vector<256x128xf32>
    %21 = vector.broadcast %18 : vector<1x128xf32> to vector<256x128xf32>
    %22 = arith.addf %20, %21 : vector<256x128xf32>
    %23 = tpu.iota {dimensions = array<i32: 1>} : vector<256x128xi32>
    %c16_i32 = arith.constant 16 : i32
    %24 = vector.broadcast %c16_i32 : i32 to vector<256x128xi32>
    %25 = arith.cmpi slt, %23, %24 : vector<256x128xi32>
    %cst_17 = arith.constant -1.000000e+30 : f32
    %26 = vector.broadcast %cst_17 : f32 to vector<256x128xf32>
    %27 = arith.select %25, %22, %26 : vector<256x128xi1>, vector<256x128xf32>
    %cst_18 = arith.constant dense<0xFF800000> : vector<256xf32>
    %28 = vector.multi_reduction <maximumf>, %27, %cst_18 [1] : vector<256x128xf32> to vector<256xf32>
    %29 = vector.shape_cast %28 : vector<256xf32> to vector<256x1xf32>
    %30 = vector.broadcast %29 : vector<256x1xf32> to vector<256x128xf32>
    %31 = arith.subf %27, %30 : vector<256x128xf32>
    %32 = math.exp %31 : vector<256x128xf32>
    %cst_19 = arith.constant dense<0.000000e+00> : vector<256xf32>
    %33 = vector.multi_reduction <add>, %32, %cst_19 [1] : vector<256x128xf32> to vector<256xf32>
    %34 = vector.shape_cast %33 : vector<256xf32> to vector<256x1xf32>
    %35 = math.log %34 : vector<256x1xf32>
    %36 = vector.broadcast %35 : vector<256x1xf32> to vector<256x128xf32>
    %37 = arith.subf %31, %36 : vector<256x128xf32>
    %c0_20 = arith.constant 0 : index
    %c0_21 = arith.constant 0 : index
    %38 = vector.load %arg8[%c0_20, %c0_21] : memref<256x128xf32, #tpu.memory_space<vmem>>, vector<256x128xf32>
    tpu.vector_store %arg8[%c0_20, %c0_21], %37 {strides = array<i32>} : memref<256x128xf32, #tpu.memory_space<vmem>>, vector<256x128xf32>,
    return
  }
  func.func @transform_0(%arg0: i32) -> (i32, i32) {
    %c0_i32 = arith.constant 0 : i32
    %c0_i32_0 = arith.constant 0 : i32
    return %arg0, %c0_i32 : i32, i32
  }
  func.func @transform_1(%arg0: i32) -> (i32, i32) {
    %c0_i32 = arith.constant 0 : i32
    %c0_i32_0 = arith.constant 0 : i32
    %c0_i32_1 = arith.constant 0 : i32
    return %c0_i32, %c0_i32_0 : i32, i32
  }
  func.func @transform_2(%arg0: i32) -> (i32, i32) {
    %c0_i32 = arith.constant 0 : i32
    %c0_i32_0 = arith.constant 0 : i32
    %c0_i32_1 = arith.constant 0 : i32
    return %c0_i32, %c0_i32_0 : i32, i32
  }
  func.func @transform_3(%arg0: i32) -> (i32, i32) {
    %c0_i32 = arith.constant 0 : i32
    %c0_i32_0 = arith.constant 0 : i32
    %c0_i32_1 = arith.constant 0 : i32
    return %c0_i32, %c0_i32_0 : i32, i32
  }
  func.func @transform_4(%arg0: i32) -> (i32, i32) {
    %c0_i32 = arith.constant 0 : i32
    %c0_i32_0 = arith.constant 0 : i32
    %c0_i32_1 = arith.constant 0 : i32
    return %c0_i32, %c0_i32_0 : i32, i32
  }
  func.func @transform_5(%arg0: i32) -> (i32, i32) {
    %c0_i32 = arith.constant 0 : i32
    %c0_i32_0 = arith.constant 0 : i32
    %c0_i32_1 = arith.constant 0 : i32
    return %c0_i32, %c0_i32_0 : i32, i32
  }
  func.func @transform_6(%arg0: i32) -> (i32, i32) {
    %c0_i32 = arith.constant 0 : i32
    %c0_i32_0 = arith.constant 0 : i32
    %c0_i32_1 = arith.constant 0 : i32
    return %c0_i32, %c0_i32_0 : i32, i32
  }
  func.func @transform_7(%arg0: i32) -> (i32, i32) {
    %c0_i32 = arith.constant 0 : i32
    %c0_i32_0 = arith.constant 0 : i32
    return %arg0, %c0_i32 : i32, i32
  }
}

</mosaic_0001>

<bundles_post_ra>
// kernel: _run_pallas_mlp.1
= control target key start
LH: loop header
LB: loop body
LE: loop exit
PB: predicated region body
PF: predicated region fallthrough
CT: control target
= control target key end

     0   :  { %12 = vsyncpa [#allocation3], 0  ;;  %s2441_s0 = inlined_call_operand.hbm [shape: f32[256,128], index: 0, kind: input, shape index: {}]   ;;  %s2442_s1 = inlined_call_operand.hbm [shape: bf16[128,128], index: 1, kind: input, shape index: {}]   ;;  %s2443_s2 = inlined_call_operand.vmem [shape: f32[1,128], index: 2, kind: input, shape index: {}]   ;;  %s2444_s3 = inlined_call_operand.hbm [shape: bf16[128,128], index: 3, kind: input, shape index: {}]   ;;  %s2445_s4 = inlined_call_operand.vmem [shape: f32[1,128], index: 4, kind: input, shape index: {}]   ;;  %s2446_s5 = inlined_call_operand.hbm [shape: bf16[128,128], index: 5, kind: input, shape index: {}]   ;;  %s2447_s6 = inlined_call_operand.vmem [shape: f32[1,128], index: 6, kind: input, shape index: {}]   ;;  %s2448_s7 = inlined_call_operand.hbm [shape: f32[256,128], index: 7, kind: output, shape index: {}]  }
   0x1   :  { %13 = vsyncpa [#allocation6], 0 }
   0x2   :  { %14 = vsyncpa [#allocation9], 0 }
   0x3   :  { %15 = vsyncpa [#allocation4], 0  ;;  %s1867_s24 = smov [#allocation5]   ;;  %s1749_s28 = scalar_lea.hbm %s2442_s1, 1024 }
   0x4   :  { %s33_s25 = sshll.u32 %s1867_s24, 4  ;;  %p1750_p0 = scmp.ne.s32.totalorder %s2442_s1, %s1749_s28  ;;  %s34_s25 = int_to_ptr.vmem [resolvable:$true] %s33_s25 }
   0x5   :  { %p1753_p1 = scmp.lt.u32.totalorder %s1749_s28, %s2442_s1 }
   0x7   :  { %p1755_p2 = pnand %p1753_p1, %p1750_p0 }
   0x9   :  { %1758 = shalt.err (!%p1755_p2)
}
   0xa   :  { %s1759_s10 = scalar_lea.vmem %s34_s25, 1024  ;;  %p1764_p4 = scmp.lt.s32.totalorder %s34_s25, %s34_s25 }
   0xb   :  { %p1760_p3 = scmp.ne.s32.totalorder %s34_s25, %s1759_s10  ;;  %p1765_p5 = scmp.lt.s32.totalorder %s1759_s10, %s1759_s10 }
   0xd   :  { %p1766_p6 = por %p1765_p5, %p1764_p4 }
   0xf   :  { %p1767_p7 = pnand %p1766_p6, %p1760_p3 }
  0x11   :  { %1770 = shalt.err (!%p1767_p7)
}
  0x12   :  { %s1868_s11 = smov 64   ;;  %s1869_s12 = smov 4  }
  0x13   :  { %39 = dma.hbm_to_vmem [thread:$0]  %s2442_s1, 1024, %s34_s25, [#allocation6], %s1868_s11, %s1868_s11, %s1869_s12  }
  0x14   :  { %s1870_s15 = smov [#allocation2]   ;;  %s1771_s19 = scalar_lea.hbm %s2441_s0, 4096 }
  0x15   :  { %s21_s16 = sshll.u32 %s1870_s15, 4  ;;  %p1772_p8 = scmp.ne.s32.totalorder %s2441_s0, %s1771_s19  ;;  %s22_s16 = int_to_ptr.vmem [resolvable:$true] %s21_s16 }
  0x16   :  { %p1775_p9 = scmp.lt.u32.totalorder %s1771_s19, %s2441_s0 }
  0x18   :  { %p1777_p10 = pnand %p1775_p9, %p1772_p8 }
  0x1a   :  { %1780 = shalt.err (!%p1777_p10)
}
  0x1b   :  { %s1781_s24 = scalar_lea.vmem %s22_s16, 4096  ;;  %p1786_p12 = scmp.lt.s32.totalorder %s22_s16, %s22_s16 }
  0x1c   :  { %p1782_p11 = scmp.ne.s32.totalorder %s22_s16, %s1781_s24  ;;  %p1787_p13 = scmp.lt.s32.totalorder %s1781_s24, %s1781_s24 }
  0x1e   :  { %p1788_p0 = por %p1787_p13, %p1786_p12 }
  0x20   :  { %p1789_p1 = pnand %p1788_p0, %p1782_p11 }
  0x22   :  { %1792 = shalt.err (!%p1789_p1)
}
  0x23   :  { %s1871_s1 = smov 128   ;;  %s1872_s25 = smov 8  }
  0x24   :  { %27 = dma.hbm_to_vmem [thread:$0]  %s2441_s0, 4096, %s22_s16, [#allocation3], %s1871_s1, %s1871_s1, %s1872_s25  }
  0x25   :  { %s1873_s28 = smov [#allocation7]   ;;  %s1874_s30 = smov [#allocation8]  }
  0x26   :  { %s47_s29 = sshll.u32 %s1873_s28, 4  ;;  %s61_s8 = sshll.u32 %s1874_s30, 4  ;;  %s48_s29 = int_to_ptr.vmem [resolvable:$true] %s47_s29  ;;  %s1946_s8 = int_to_ptr.vmem [resolvable:$true] %s61_s8 }
  0x27   :  { %s1793_s13 = scalar_lea.hbm %s2444_s3, 1024 }
  0x28   :  { %p1794_p2 = scmp.ne.s32.totalorder %s2444_s3, %s1793_s13  ;;  %p1797_p3 = scmp.lt.u32.totalorder %s1793_s13, %s2444_s3 }
  0x2a   :  { %p1799_p4 = pnand %p1797_p3, %p1794_p2 }
  0x2c   :  { %1802 = shalt.err (!%p1799_p4)
}
  0x2d   :  { %s1803_s0 = scalar_lea.vmem %s48_s29, 1024  ;;  %p1808_p6 = scmp.lt.s32.totalorder %s48_s29, %s48_s29 }
  0x2e   :  { %p1804_p5 = scmp.ne.s32.totalorder %s48_s29, %s1803_s0  ;;  %p1809_p7 = scmp.lt.s32.totalorder %s1803_s0, %s1803_s0 }
  0x30   :  { %p1810_p8 = por %p1809_p7, %p1808_p6 }
  0x32   :  { %p1811_p9 = pnand %p1810_p8, %p1804_p5 }
  0x34   :  { %1814 = shalt.err (!%p1811_p9)
}
  0x35   :  { %53 = dma.hbm_to_vmem [thread:$0]  %s2444_s3, 1024, %s48_s29, [#allocation6], %s1868_s11, %s1868_s11, %s1869_s12  }
  0x36   :  { %s1815_s22 = scalar_lea.hbm %s2446_s5, 1024 }
  0x37   :  { %p1816_p10 = scmp.ne.s32.totalorder %s2446_s5, %s1815_s22  ;;  %p1819_p11 = scmp.lt.u32.totalorder %s1815_s22, %s2446_s5 }
  0x39   :  { %p1821_p12 = pnand %p1819_p11, %p1816_p10 }
  0x3b   :  { %1824 = shalt.err (!%p1821_p12)
}
  0x3c   :  { %s1825_s28 = scalar_lea.vmem %s1946_s8, 1024  ;;  %p1830_p0 = scmp.lt.s32.totalorder %s1946_s8, %s1946_s8 }
  0x3d   :  { %p1826_p13 = scmp.ne.s32.totalorder %s1946_s8, %s1825_s28  ;;  %p1831_p1 = scmp.lt.s32.totalorder %s1825_s28, %s1825_s28 }
  0x3f   :  { %p1832_p2 = por %p1831_p1, %p1830_p0 }
  0x41   :  { %p1833_p3 = pnand %p1832_p2, %p1826_p13 }
  0x43   :  { %1836 = shalt.err (!%p1833_p3)
}
  0x44   :  { %67 = dma.hbm_to_vmem [thread:$0]  %s2446_s5, 1024, %s1946_s8, [#allocation9], %s1868_s11, %s1868_s11, %s1869_s12  }
  0x45   :  { %1859 = dma.done.wait [#allocation3], 4096  }
  0x46   :  { %1860 = vsyncadd [#allocation3], 4294963200 }
  0x47   :  { %1861 = dma.done.wait [#allocation6], 2048  }
  0x48   :  { %1862 = vsyncadd [#allocation6], 4294965248 }
  0x49   :  { %1863 = dma.done.wait [#allocation9], 1024  }
  0x4a   :  { %1864 = vsyncadd [#allocation9], 4294966272  ;;  %v1597_v0 = vld [vmem:[#allocation5] sm:$0xff]   ;;  %v1598_v1 = vld [vmem:[#allocation5 + $0x8] sm:$0xff]  }
  0x4b   :  { %1428 = vmatprep.subr.bf16.mxu0 %v1597_v0  ;;  %1572 = vmatprep.subr.bf16.mxu1 %v1597_v0  ;;  %v1599_v2 = vld [vmem:[#allocation5 + $0x10] sm:$0xff]   ;;  %v1600_v3 = vld [vmem:[#allocation5 + $0x18] sm:$0xff]   ;;  %v83_v4 = vld [vmem:[#allocation2] sm:$0xff] }
  0x4c   :  { %1429 = vmatpush3.bf16.msra.mxu0 %v1597_v0  ;;  %1580 = vmatpush3.bf16.msra.mxu1 %v1597_v0  ;;  %v84_v5 = vld [vmem:[#allocation2 + $0x8] sm:$0xff]  ;;  %v1601_v7 = vld [vmem:[#allocation5 + $0x20] sm:$0xff]   ;;  %v1603_v12 = vld [vmem:[#allocation5 + $0x30] sm:$0xff]  }
  0x4d   :  { %1430 = vmatprep.subr.bf16.mxu0 %v1598_v1  ;;  %1573 = vmatprep.subr.bf16.mxu1 %v1598_v1  ;;  %v132_v6 = vpack.c.bf16 %v84_v5, %v83_v4  ;;  %v99_v8 = vld [vmem:[#allocation2 + $0x80] sm:$0xff]  ;;  %v100_v9 = vld [vmem:[#allocation2 + $0x88] sm:$0xff]  ;;  %v1604_v13 = vld [vmem:[#allocation5 + $0x38] sm:$0xff]  }
  0x4e   :  { %v140_v10 = vpack.c.bf16 %v100_v9, %v99_v8  ;;  %v1602_v11 = vld [vmem:[#allocation5 + $0x28] sm:$0xff]   ;;  %v85_v14 = vld [vmem:[#allocation2 + $0x10] sm:$0xff]  ;;  %v86_v15 = vld [vmem:[#allocation2 + $0x18] sm:$0xff] }
  0x4f   :  { %1444 = vmatprep.mubr.bf16.mxu0 %v132_v6  ;;  %v87_v16 = vld [vmem:[#allocation2 + $0x20] sm:$0xff]  ;;  %v88_v17 = vld [vmem:[#allocation2 + $0x28] sm:$0xff]  ;;  %v101_v18 = vld [vmem:[#allocation2 + $0x90] sm:$0xff]  ;;  %v133_v23 = vpack.c.bf16 %v86_v15, %v85_v14 }
  0x50   :  { %1431 = vmatpush3.bf16.msra.mxu0 %v1598_v1  ;;  %1581 = vmatpush3.bf16.msra.mxu1 %v1598_v1  ;;  %v102_v19 = vld [vmem:[#allocation2 + $0x98] sm:$0xff]  ;;  %v103_v20 = vld [vmem:[#allocation2 + $0xa0] sm:$0xff]  ;;  %v104_v21 = vld [vmem:[#allocation2 + $0xa8] sm:$0xff]  ;;  %v134_v24 = vpack.c.bf16 %v88_v17, %v87_v16 }
  0x51   :  { %1432 = vmatprep.subr.bf16.mxu0 %v1599_v2  ;;  %1574 = vmatprep.subr.bf16.mxu1 %v1599_v2  ;;  %v1605_v22 = vld [vmem:[#allocation7] sm:$0xff]   ;;  %v141_v25 = vpack.c.bf16 %v102_v19, %v101_v18  ;;  %v142_v26 = vpack.c.bf16 %v104_v21, %v103_v20  ;;  %v1606_v27 = vld [vmem:[#allocation7 + $0x8] sm:$0xff]   ;;  %v89_v28 = vld [vmem:[#allocation2 + $0x30] sm:$0xff] }
  0x52   :  { %1460 = vmatprep.mubr.bf16.mxu1 %v140_v10  ;;  %v90_v29 = vld [vmem:[#allocation2 + $0x38] sm:$0xff]  ;;  %v91_v30 = vld [vmem:[#allocation2 + $0x40] sm:$0xff]  ;;  %v92_v31 = vld [vmem:[#allocation2 + $0x48] sm:$0xff] }
  0x53   :  { %v105_v32 = vld [vmem:[#allocation2 + $0xb0] sm:$0xff]  ;;  %v106_v33 = vld [vmem:[#allocation2 + $0xb8] sm:$0xff]  ;;  %v107_v34 = vld [vmem:[#allocation2 + $0xc0] sm:$0xff]  ;;  %v135_v37 = vpack.c.bf16 %v90_v29, %v89_v28  ;;  %v136_v38 = vpack.c.bf16 %v92_v31, %v91_v30 }
  0x54   :  { %1433 = vmatpush3.bf16.msra.mxu0 %v1599_v2  ;;  %1582 = vmatpush3.bf16.msra.mxu1 %v1599_v2  ;;  %v108_v35 = vld [vmem:[#allocation2 + $0xc8] sm:$0xff]  ;;  %v1607_v36 = vld [vmem:[#allocation7 + $0x10] sm:$0xff]   ;;  %v143_v39 = vpack.c.bf16 %v106_v33, %v105_v32  ;;  %v1608_v41 = vld [vmem:[#allocation7 + $0x18] sm:$0xff]  }
  0x55   :  { %1434 = vmatprep.subr.bf16.mxu0 %v1600_v3  ;;  %1575 = vmatprep.subr.bf16.mxu1 %v1600_v3  ;;  %v144_v40 = vpack.c.bf16 %v108_v35, %v107_v34  ;;  %v93_v42 = vld [vmem:[#allocation2 + $0x50] sm:$0xff]  ;;  %v94_v43 = vld [vmem:[#allocation2 + $0x58] sm:$0xff]  ;;  %v95_v44 = vld [vmem:[#allocation2 + $0x60] sm:$0xff] }
  0x56   :  { %v96_v45 = vld [vmem:[#allocation2 + $0x68] sm:$0xff]  ;;  %v109_v46 = vld [vmem:[#allocation2 + $0xd0] sm:$0xff]  ;;  %v110_v47 = vld [vmem:[#allocation2 + $0xd8] sm:$0xff]  ;;  %v137_v51 = vpack.c.bf16 %v94_v43, %v93_v42 }
  0x57   :  { %v111_v48 = vld [vmem:[#allocation2 + $0xe0] sm:$0xff]  ;;  %v112_v49 = vld [vmem:[#allocation2 + $0xe8] sm:$0xff]  ;;  %v138_v52 = vpack.c.bf16 %v96_v45, %v95_v44  ;;  %v145_v53 = vpack.c.bf16 %v110_v47, %v109_v46  ;;  %v97_v56 = vld [vmem:[#allocation2 + $0x70] sm:$0xff] }
  0x58   :  { %1435 = vmatpush3.bf16.msra.mxu0 %v1600_v3  ;;  %1583 = vmatpush3.bf16.msra.mxu1 %v1600_v3  ;;  %v1609_v50 = vld [vmem:[#allocation7 + $0x20] sm:$0xff]   ;;  %v146_v54 = vpack.c.bf16 %v112_v49, %v111_v48  ;;  %v1610_v55 = vld [vmem:[#allocation7 + $0x28] sm:$0xff]   ;;  %v98_v57 = vld [vmem:[#allocation2 + $0x78] sm:$0xff] }
  0x59   :  { %1436 = vmatprep.subr.bf16.mxu0 %v1601_v7  ;;  %1576 = vmatprep.subr.bf16.mxu1 %v1601_v7  ;;  %v113_v58 = vld [vmem:[#allocation2 + $0xf0] sm:$0xff]  ;;  %v114_v59 = vld [vmem:[#allocation2 + $0xf8] sm:$0xff]  ;;  %v139_v60 = vpack.c.bf16 %v98_v57, %v97_v56  ;;  %v1613_v0 = vld [vmem:[#allocation8] sm:$0xff]  }
  0x5a   :  { %v147_v61 = vpack.c.bf16 %v114_v59, %v113_v58  ;;  %v1611_v62 = vld [vmem:[#allocation7 + $0x30] sm:$0xff]   ;;  %v1612_v63 = vld [vmem:[#allocation7 + $0x38] sm:$0xff]   ;;  %v1614_v1 = vld [vmem:[#allocation8 + $0x8] sm:$0xff]  }
  0x5b   :  { %v1615_v2 = vld [vmem:[#allocation8 + $0x10] sm:$0xff]   ;;  %v1616_v3 = vld [vmem:[#allocation8 + $0x18] sm:$0xff]   ;;  %v1617_v4 = vld [vmem:[#allocation8 + $0x20] sm:$0xff]  }
  0x5c   :  { %1437 = vmatpush3.bf16.msra.mxu0 %v1601_v7  ;;  %1584 = vmatpush3.bf16.msra.mxu1 %v1601_v7  ;;  %v1618_v5 = vld [vmem:[#allocation8 + $0x28] sm:$0xff]   ;;  %v1986_v6 = vld [vmem:[%s2443_s2] ss:$0 sm:$0xff] }
  0x5d   :  { %1438 = vmatprep.subr.bf16.mxu0 %v1602_v11  ;;  %1577 = vmatprep.subr.bf16.mxu1 %v1602_v11 }
  0x60   :  { %1439 = vmatpush3.bf16.msra.mxu0 %v1602_v11  ;;  %1585 = vmatpush3.bf16.msra.mxu1 %v1602_v11 }
  0x61   :  { %1440 = vmatprep.subr.bf16.mxu0 %v1603_v12  ;;  %1578 = vmatprep.subr.bf16.mxu1 %v1603_v12 }
  0x64   :  { %1441 = vmatpush3.bf16.msra.mxu0 %v1603_v12  ;;  %1586 = vmatpush3.bf16.msra.mxu1 %v1603_v12 }
  0x65   :  { %1442 = vmatprep.subr.bf16.mxu0 %v1604_v13  ;;  %1579 = vmatprep.subr.bf16.mxu1 %v1604_v13 }
  0x68   :  { %1443 = vmatpush3.bf16.msra.mxu0 %v1604_v13  ;;  %1587 = vmatpush3.bf16.msra.mxu1 %v1604_v13 }
  0x69   :  { %1476 = vmatprep.subr.bf16.mxu1 %v1605_v22  ;;  %1524 = vmatprep.subr.bf16.mxu0 %v1613_v0 }
  0x6b   :  { %1445 = vmatmul.mubr.bf16.vlgmr.msra.gmra.mrb[0].mxu0 %v133_v23  ;;  %1461 = vmatmul.mubr.bf16.vlgmr.msra.gmra.mrb[0].mxu1 %v141_v25 }
  0x6c   :  { %1448 = vmatprep.mubr.bf16.mxu0 %v134_v24  ;;  %1464 = vmatprep.mubr.bf16.mxu1 %v142_v26 }
  0x6d   :  { %1477 = vmatpush3.bf16.msra.mxu1 %v1605_v22  ;;  %1525 = vmatpush3.bf16.msra.mxu0 %v1613_v0 }
  0x6e   :  { %1478 = vmatprep.subr.bf16.mxu1 %v1606_v27  ;;  %1526 = vmatprep.subr.bf16.mxu0 %v1614_v1 }
  0x71   :  { %1479 = vmatpush3.bf16.msra.mxu1 %v1606_v27  ;;  %1527 = vmatpush3.bf16.msra.mxu0 %v1614_v1 }
  0x72   :  { %1480 = vmatprep.subr.bf16.mxu1 %v1607_v36  ;;  %1528 = vmatprep.subr.bf16.mxu0 %v1615_v2 }
  0x73   :  { %1449 = vmatmul.mubr.bf16.gmra.mrb[4].mxu0 %v135_v37  ;;  %1465 = vmatmul.mubr.bf16.gmra.mrb[4].mxu1 %v143_v39 }
  0x74   :  { %1452 = vmatprep.mubr.bf16.mxu0 %v136_v38  ;;  %1468 = vmatprep.mubr.bf16.mxu1 %v144_v40 }
  0x75   :  { %1481 = vmatpush3.bf16.msra.mxu1 %v1607_v36  ;;  %1529 = vmatpush3.bf16.msra.mxu0 %v1615_v2 }
  0x76   :  { %1482 = vmatprep.subr.bf16.mxu1 %v1608_v41  ;;  %1530 = vmatprep.subr.bf16.mxu0 %v1616_v3 }
  0x79   :  { %1483 = vmatpush3.bf16.msra.mxu1 %v1608_v41  ;;  %1531 = vmatpush3.bf16.msra.mxu0 %v1616_v3 }
  0x7a   :  { %1484 = vmatprep.subr.bf16.mxu1 %v1609_v50  ;;  %1532 = vmatprep.subr.bf16.mxu0 %v1617_v4 }
  0x7b   :  { %1453 = vmatmul.mubr.bf16.gmra.mrb[8].mxu0 %v137_v51  ;;  %1469 = vmatmul.mubr.bf16.gmra.mrb[8].mxu1 %v145_v53 }
  0x7c   :  { %1456 = vmatprep.mubr.bf16.mxu0 %v138_v52  ;;  %1472 = vmatprep.mubr.bf16.mxu1 %v146_v54 }
  0x7d   :  { %1485 = vmatpush3.bf16.msra.mxu1 %v1609_v50  ;;  %1533 = vmatpush3.bf16.msra.mxu0 %v1617_v4 }
  0x7e   :  { %1486 = vmatprep.subr.bf16.mxu1 %v1610_v55  ;;  %1534 = vmatprep.subr.bf16.mxu0 %v1618_v5 }
  0x81   :  { %1487 = vmatpush3.bf16.msra.mxu1 %v1610_v55  ;;  %1535 = vmatpush3.bf16.msra.mxu0 %v1618_v5 }
  0x82   :  { %1488 = vmatprep.subr.bf16.mxu1 %v1611_v62 }
  0x83   :  { %1457 = vmatmul.mubr.bf16.gmra.mrb[12].mxu0 %v139_v60  ;;  %1473 = vmatmul.mubr.bf16.gmra.mrb[12].mxu1 %v147_v61 }
  0x85   :  { %1489 = vmatpush3.bf16.msra.mxu1 %v1611_v62 }
  0x86   :  { %1490 = vmatprep.subr.bf16.mxu1 %v1612_v63 }
  0x89   :  { %1491 = vmatpush3.bf16.msra.mxu1 %v1612_v63 }
 0x13e   :  { %v1446_v7 = vpop.f32.mrb[0].mxu0  ;;  %v1462_v10 = vpop.f32.mrb[0].mxu1 }
 0x13f   :  { %v245_v8 = vadd.f32 %v1446_v7, %v1986_v6  ;;  %v236_v9 = vpop.f32.mrb[1].mxu0  ;;  %v309_v13 = vadd.f32 %v1462_v10, %v1986_v6  ;;  %v300_v14 = vpop.f32.mrb[1].mxu1 }
 0x140   :  { %v237_v11 = vadd.f32 %v1986_v6, %v236_v9  ;;  %v1447_v12 = vpop.f32.mrb[2].mxu0  ;;  %v301_v17 = vadd.f32 %v1986_v6, %v300_v14  ;;  %v1463_v18 = vpop.f32.mrb[2].mxu1 }
 0x141   :  { %v248_v15 = vadd.f32 %v1447_v12, %v1986_v6  ;;  %v239_v16 = vpop.f32.mrb[3].mxu0  ;;  %v381_v20 = vmax.f32 %v309_v13, 0.0  ;;  %v312_v21 = vadd.f32 %v1463_v18, %v1986_v6  ;;  %v303_v22 = vpop.f32.mrb[3].mxu1  ;;  %v365_v23 = vmax.f32 %v245_v8, 0.0 }
 0x142   :  { %v240_v19 = vadd.f32 %v1986_v6, %v239_v16  ;;  %v379_v25 = vmax.f32 %v301_v17, 0.0  ;;  %v304_v26 = vadd.f32 %v1986_v6, %v303_v22  ;;  %v363_v27 = vmax.f32 %v237_v11, 0.0 }
 0x143   :  { %v366_v24 = vmax.f32 %v248_v15, 0.0  ;;  %v382_v29 = vmax.f32 %v312_v21, 0.0 }
 0x144   :  { %v364_v28 = vmax.f32 %v240_v19, 0.0  ;;  %v380_v31 = vmax.f32 %v304_v26, 0.0 }
 0x145   :  { %v413_v30 = vpack.c.bf16 %v366_v24, %v365_v23  ;;  %v1996_v34 = vpack.c.bf16 %v382_v29, %v381_v20 }
 0x146   :  { %v412_v32 = vpack.c.bf16 %v364_v28, %v363_v27  ;;  %v1450_v33 = vpop.f32.mrb[4].mxu0  ;;  %v1999_v37 = vpack.c.bf16 %v380_v31, %v379_v25  ;;  %v1466_v38 = vpop.f32.mrb[4].mxu1 }
 0x147   :  { %v261_v35 = vadd.f32 %v1450_v33, %v1986_v6  ;;  %v252_v36 = vpop.f32.mrb[5].mxu0  ;;  %v325_v41 = vadd.f32 %v1466_v38, %v1986_v6  ;;  %v316_v42 = vpop.f32.mrb[5].mxu1 }
 0x148   :  { %v253_v39 = vadd.f32 %v1986_v6, %v252_v36  ;;  %v1451_v40 = vpop.f32.mrb[6].mxu0  ;;  %1492 = vmatprep.mubr.bf16.mxu1 %v412_v32  ;;  %v317_v46 = vadd.f32 %v1986_v6, %v316_v42  ;;  %v1467_v47 = vpop.f32.mrb[6].mxu1 }
 0x149   :  { %v369_v43 = vmax.f32 %v261_v35, 0.0  ;;  %v264_v44 = vadd.f32 %v1451_v40, %v1986_v6  ;;  %v255_v45 = vpop.f32.mrb[7].mxu0  ;;  %1493 = vmatmul.mubr.bf16.vlgmr.msra.gmra.mrb[16].mxu1 %v413_v30  ;;  %v385_v49 = vmax.f32 %v325_v41, 0.0  ;;  %v328_v50 = vadd.f32 %v1467_v47, %v1986_v6  ;;  %v319_v51 = vpop.f32.mrb[7].mxu1 }
 0x14a   :  { %v256_v48 = vadd.f32 %v1986_v6, %v255_v45  ;;  %v383_v53 = vmax.f32 %v317_v46, 0.0  ;;  %v320_v54 = vadd.f32 %v1986_v6, %v319_v51  ;;  %v367_v55 = vmax.f32 %v253_v39, 0.0 }
 0x14b   :  { %v370_v52 = vmax.f32 %v264_v44, 0.0  ;;  %v386_v57 = vmax.f32 %v328_v50, 0.0 }
 0x14c   :  { %v368_v56 = vmax.f32 %v256_v48, 0.0  ;;  %v384_v59 = vmax.f32 %v320_v54, 0.0 }
 0x14d   :  { %v415_v58 = vpack.c.bf16 %v370_v52, %v369_v43  ;;  %v2008_v62 = vpack.c.bf16 %v386_v57, %v385_v49 }
 0x14e   :  { %v414_v60 = vpack.c.bf16 %v368_v56, %v367_v55  ;;  %v1454_v61 = vpop.f32.mrb[8].mxu0  ;;  %v422_v1 = vpack.c.bf16 %v384_v59, %v383_v53  ;;  %v1470_v2 = vpop.f32.mrb[8].mxu1  ;;  %v2032_v59 = vld [vmem:[%s2445_s4] ss:$0 sm:$0xff] }
 0x14f   :  { %v277_v63 = vadd.f32 %v1454_v61, %v1986_v6  ;;  %v268_v0 = vpop.f32.mrb[9].mxu0  ;;  %v341_v5 = vadd.f32 %v1470_v2, %v1986_v6  ;;  %v332_v7 = vpop.f32.mrb[9].mxu1 }
 0x150   :  { %v269_v3 = vadd.f32 %v1986_v6, %v268_v0  ;;  %v1455_v4 = vpop.f32.mrb[10].mxu0  ;;  %1496 = vmatprep.mubr.bf16.mxu1 %v414_v60  ;;  %v333_v11 = vadd.f32 %v1986_v6, %v332_v7  ;;  %v1471_v12 = vpop.f32.mrb[10].mxu1 }
 0x151   :  { %v373_v8 = vmax.f32 %v277_v63, 0.0  ;;  %v280_v9 = vadd.f32 %v1455_v4, %v1986_v6  ;;  %v271_v10 = vpop.f32.mrb[11].mxu0  ;;  %1497 = vmatmul.mubr.bf16.gmra.mrb[20].mxu1 %v415_v58  ;;  %v389_v14 = vmax.f32 %v341_v5, 0.0  ;;  %v344_v15 = vadd.f32 %v1471_v12, %v1986_v6  ;;  %v335_v16 = vpop.f32.mrb[11].mxu1  ;;  %v1620_v58 = vld [vmem:[#allocation8 + $0x38] sm:$0xff]  }
 0x152   :  { %v272_v13 = vadd.f32 %v1986_v6, %v271_v10  ;;  %v387_v18 = vmax.f32 %v333_v11, 0.0  ;;  %v336_v19 = vadd.f32 %v1986_v6, %v335_v16  ;;  %v371_v20 = vmax.f32 %v269_v3, 0.0 }
 0x153   :  { %v374_v17 = vmax.f32 %v280_v9, 0.0  ;;  %v390_v22 = vmax.f32 %v344_v15, 0.0 }
 0x154   :  { %v372_v21 = vmax.f32 %v272_v13, 0.0  ;;  %v388_v24 = vmax.f32 %v336_v19, 0.0 }
 0x155   :  { %v417_v23 = vpack.c.bf16 %v374_v17, %v373_v8  ;;  %v425_v27 = vpack.c.bf16 %v390_v22, %v389_v14 }
 0x156   :  { %v416_v25 = vpack.c.bf16 %v372_v21, %v371_v20  ;;  %v1458_v26 = vpop.f32.mrb[12].mxu0  ;;  %v424_v30 = vpack.c.bf16 %v388_v24, %v387_v18  ;;  %v1474_v31 = vpop.f32.mrb[12].mxu1 }
 0x157   :  { %v293_v28 = vadd.f32 %v1458_v26, %v1986_v6  ;;  %v284_v29 = vpop.f32.mrb[13].mxu0  ;;  %v357_v35 = vadd.f32 %v1474_v31, %v1986_v6  ;;  %v348_v36 = vpop.f32.mrb[13].mxu1 }
 0x158   :  { %v285_v32 = vadd.f32 %v1986_v6, %v284_v29  ;;  %v1459_v33 = vpop.f32.mrb[14].mxu0  ;;  %1500 = vmatprep.mubr.bf16.mxu1 %v416_v25  ;;  %v349_v41 = vadd.f32 %v1986_v6, %v348_v36  ;;  %v1475_v42 = vpop.f32.mrb[14].mxu1 }
 0x159   :  { %v377_v38 = vmax.f32 %v293_v28, 0.0  ;;  %v296_v39 = vadd.f32 %v1459_v33, %v1986_v6  ;;  %v287_v40 = vpop.f32.mrb[15].mxu0  ;;  %1501 = vmatmul.mubr.bf16.gmra.mrb[24].mxu1 %v417_v23  ;;  %v393_v44 = vmax.f32 %v357_v35, 0.0  ;;  %v360_v45 = vadd.f32 %v1475_v42, %v1986_v6  ;;  %v351_v46 = vpop.f32.mrb[15].mxu1 }
 0x15a   :  { %v288_v43 = vadd.f32 %v1986_v6, %v287_v40  ;;  %v391_v48 = vmax.f32 %v349_v41, 0.0  ;;  %v352_v49 = vadd.f32 %v1986_v6, %v351_v46  ;;  %v375_v50 = vmax.f32 %v285_v32, 0.0  ;;  %v1619_v6 = vld [vmem:[#allocation8 + $0x30] sm:$0xff]  }
 0x15b   :  { %v378_v47 = vmax.f32 %v296_v39, 0.0  ;;  %v394_v52 = vmax.f32 %v360_v45, 0.0  ;;  %1536 = vmatprep.subr.bf16.mxu0 %v1619_v6 }
 0x15c   :  { %v376_v51 = vmax.f32 %v288_v43, 0.0  ;;  %v392_v54 = vmax.f32 %v352_v49, 0.0  ;;  %1537 = vmatpush3.bf16.msra.mxu0 %v1619_v6 }
 0x15d   :  { %v419_v53 = vpack.c.bf16 %v378_v47, %v377_v38  ;;  %v427_v56 = vpack.c.bf16 %v394_v52, %v393_v44  ;;  %1538 = vmatprep.subr.bf16.mxu0 %v1620_v58 }
 0x15e   :  { %v418_v55 = vpack.c.bf16 %v376_v51, %v375_v50  ;;  %v426_v57 = vpack.c.bf16 %v392_v54, %v391_v48 }
 0x160   :  { %1504 = vmatprep.mubr.bf16.mxu1 %v418_v55  ;;  %1539 = vmatpush3.bf16.msra.mxu0 %v1620_v58 }
 0x161   :  { %1505 = vmatmul.mubr.bf16.gmra.mrb[28].mxu1 %v419_v53 }
 0x162   :  { %1508 = vmatprep.mubr.bf16.mxu1 %v1999_v37 }
 0x169   :  { %1509 = vmatmul.mubr.bf16.gmra.mrb[32].mxu1 %v1996_v34 }
 0x16a   :  { %1512 = vmatprep.mubr.bf16.mxu1 %v422_v1 }
 0x171   :  { %1513 = vmatmul.mubr.bf16.gmra.mrb[36].mxu1 %v2008_v62 }
 0x172   :  { %1516 = vmatprep.mubr.bf16.mxu1 %v424_v30 }
 0x179   :  { %1517 = vmatmul.mubr.bf16.gmra.mrb[40].mxu1 %v425_v27 }
 0x17a   :  { %1520 = vmatprep.mubr.bf16.mxu1 %v426_v57 }
 0x181   :  { %1521 = vmatmul.mubr.bf16.gmra.mrb[44].mxu1 %v427_v56 }
 0x21c   :  { %v1494_v37 = vpop.f32.mrb[16].mxu1 }
 0x21d   :  { %v525_v34 = vadd.f32 %v1494_v37, %v2032_v59  ;;  %v516_v60 = vpop.f32.mrb[17].mxu1 }
 0x21e   :  { %v517_v61 = vadd.f32 %v2032_v59, %v516_v60  ;;  %v1495_v62 = vpop.f32.mrb[18].mxu1 }
 0x21f   :  { %v528_v63 = vadd.f32 %v1495_v62, %v2032_v59  ;;  %v519_v0 = vpop.f32.mrb[19].mxu1  ;;  %v645_v2 = vmax.f32 %v525_v34, 0.0 }
 0x220   :  { %v520_v1 = vadd.f32 %v2032_v59, %v519_v0  ;;  %v643_v4 = vmax.f32 %v517_v61, 0.0 }
 0x221   :  { %v646_v3 = vmax.f32 %v528_v63, 0.0 }
 0x222   :  { %v644_v5 = vmax.f32 %v520_v1, 0.0 }
 0x223   :  { %v693_v7 = vpack.c.bf16 %v646_v3, %v645_v2 }
 0x224   :  { %v692_v8 = vpack.c.bf16 %v644_v5, %v643_v4  ;;  %v1498_v9 = vpop.f32.mrb[20].mxu1 }
 0x225   :  { %v541_v10 = vadd.f32 %v1498_v9, %v2032_v59  ;;  %v532_v11 = vpop.f32.mrb[21].mxu1 }
 0x226   :  { %v533_v12 = vadd.f32 %v2032_v59, %v532_v11  ;;  %v1499_v13 = vpop.f32.mrb[22].mxu1  ;;  %1540 = vmatprep.mubr.bf16.mxu0 %v692_v8 }
 0x227   :  { %v544_v14 = vadd.f32 %v1499_v13, %v2032_v59  ;;  %v535_v15 = vpop.f32.mrb[23].mxu1  ;;  %1541 = vmatmul.mubr.bf16.vlgmr.msra.gmra.mrb[16].mxu0 %v693_v7  ;;  %v649_v17 = vmax.f32 %v541_v10, 0.0 }
 0x228   :  { %v536_v16 = vadd.f32 %v2032_v59, %v535_v15  ;;  %v647_v19 = vmax.f32 %v533_v12, 0.0 }
 0x229   :  { %v650_v18 = vmax.f32 %v544_v14, 0.0 }
 0x22a   :  { %v648_v20 = vmax.f32 %v536_v16, 0.0 }
 0x22b   :  { %v695_v21 = vpack.c.bf16 %v650_v18, %v649_v17 }
 0x22c   :  { %v694_v22 = vpack.c.bf16 %v648_v20, %v647_v19  ;;  %v1502_v23 = vpop.f32.mrb[24].mxu1 }
 0x22d   :  { %v557_v24 = vadd.f32 %v1502_v23, %v2032_v59  ;;  %v548_v25 = vpop.f32.mrb[25].mxu1 }
 0x22e   :  { %v549_v26 = vadd.f32 %v2032_v59, %v548_v25  ;;  %v1503_v27 = vpop.f32.mrb[26].mxu1  ;;  %1544 = vmatprep.mubr.bf16.mxu0 %v694_v22 }
 0x22f   :  { %v560_v28 = vadd.f32 %v1503_v27, %v2032_v59  ;;  %v551_v29 = vpop.f32.mrb[27].mxu1  ;;  %1545 = vmatmul.mubr.bf16.gmra.mrb[20].mxu0 %v695_v21  ;;  %v653_v31 = vmax.f32 %v557_v24, 0.0 }
 0x230   :  { %v552_v30 = vadd.f32 %v2032_v59, %v551_v29  ;;  %v651_v33 = vmax.f32 %v549_v26, 0.0 }
 0x231   :  { %v654_v32 = vmax.f32 %v560_v28, 0.0 }
 0x232   :  { %v652_v35 = vmax.f32 %v552_v30, 0.0 }
 0x233   :  { %v697_v36 = vpack.c.bf16 %v654_v32, %v653_v31 }
 0x234   :  { %v696_v38 = vpack.c.bf16 %v652_v35, %v651_v33  ;;  %v1506_v39 = vpop.f32.mrb[28].mxu1 }
 0x235   :  { %v573_v40 = vadd.f32 %v1506_v39, %v2032_v59  ;;  %v564_v41 = vpop.f32.mrb[29].mxu1 }
 0x236   :  { %v565_v42 = vadd.f32 %v2032_v59, %v564_v41  ;;  %v1507_v43 = vpop.f32.mrb[30].mxu1  ;;  %1548 = vmatprep.mubr.bf16.mxu0 %v696_v38 }
 0x237   :  { %v576_v44 = vadd.f32 %v1507_v43, %v2032_v59  ;;  %v567_v45 = vpop.f32.mrb[31].mxu1  ;;  %1549 = vmatmul.mubr.bf16.gmra.mrb[24].mxu0 %v697_v36  ;;  %v657_v47 = vmax.f32 %v573_v40, 0.0 }
 0x238   :  { %v568_v46 = vadd.f32 %v2032_v59, %v567_v45  ;;  %v655_v49 = vmax.f32 %v565_v42, 0.0 }
 0x239   :  { %v658_v48 = vmax.f32 %v576_v44, 0.0 }
 0x23a   :  { %v656_v50 = vmax.f32 %v568_v46, 0.0  ;;  %v923_v46 = vlaneseq }
 0x23b   :  { %v699_v51 = vpack.c.bf16 %v658_v48, %v657_v47  ;;  %v2071_v48 = vld [vmem:[%s2447_s6] ss:$0 sm:$0xff]  ;;  %s1875_s6 = smov [#allocation10]  }
 0x23c   :  { %v698_v52 = vpack.c.bf16 %v656_v50, %v655_v49  ;;  %v1510_v53 = vpop.f32.mrb[32].mxu1  ;;  %v2066_v47 = vand.u32 127, %v923_v46  ;;  %s1315_s8 = sshll.u32 %s1875_s6, 4  ;;  %s1316_s8 = int_to_ptr.vmem [resolvable:$true] %s1315_s8 }
 0x23d   :  { %v589_v54 = vadd.f32 %v1510_v53, %v2032_v59  ;;  %v580_v55 = vpop.f32.mrb[33].mxu1  ;;  %s1837_s9 = scalar_lea.vmem %s1316_s8, 4096  ;;  %p1842_p5 = scmp.lt.s32.totalorder %s1316_s8, %s1316_s8 }
 0x23e   :  { %v581_v56 = vadd.f32 %v2032_v59, %v580_v55  ;;  %v1511_v57 = vpop.f32.mrb[34].mxu1  ;;  %1552 = vmatprep.mubr.bf16.mxu0 %v698_v52  ;;  %vm925_vm0 = vcmp.lt.s32.totalorder %v2066_v47, 16  ;;  %p1838_p4 = scmp.ne.s32.totalorder %s1316_s8, %s1837_s9  ;;  %p1843_p6 = scmp.lt.s32.totalorder %s1837_s9, %s1837_s9 }
 0x23f   :  { %v592_v6 = vadd.f32 %v1511_v57, %v2032_v59  ;;  %v583_v58 = vpop.f32.mrb[35].mxu1  ;;  %1553 = vmatmul.mubr.bf16.gmra.mrb[28].mxu0 %v699_v51  ;;  %v661_v34 = vmax.f32 %v589_v54, 0.0 }
 0x240   :  { %v584_v37 = vadd.f32 %v2032_v59, %v583_v58  ;;  %v659_v61 = vmax.f32 %v581_v56, 0.0  ;;  %p1844_p7 = por %p1843_p6, %p1842_p5 }
 0x241   :  { %v662_v60 = vmax.f32 %v592_v6, 0.0 }
 0x242   :  { %v660_v62 = vmax.f32 %v584_v37, 0.0  ;;  %p1845_p8 = pnand %p1844_p7, %p1838_p4 }
 0x243   :  { %v701_v63 = vpack.c.bf16 %v662_v60, %v661_v34 }
 0x244   :  { %v700_v0 = vpack.c.bf16 %v660_v62, %v659_v61  ;;  %v1514_v1 = vpop.f32.mrb[36].mxu1 }
 0x245   :  { %v605_v2 = vadd.f32 %v1514_v1, %v2032_v59  ;;  %v596_v3 = vpop.f32.mrb[37].mxu1 }
 0x246   :  { %v597_v4 = vadd.f32 %v2032_v59, %v596_v3  ;;  %v1515_v5 = vpop.f32.mrb[38].mxu1  ;;  %1556 = vmatprep.mubr.bf16.mxu0 %v700_v0 }
 0x247   :  { %v608_v7 = vadd.f32 %v1515_v5, %v2032_v59  ;;  %v599_v8 = vpop.f32.mrb[39].mxu1  ;;  %1557 = vmatmul.mubr.bf16.gmra.mrb[32].mxu0 %v701_v63  ;;  %v665_v10 = vmax.f32 %v605_v2, 0.0 }
 0x248   :  { %v600_v9 = vadd.f32 %v2032_v59, %v599_v8  ;;  %v663_v12 = vmax.f32 %v597_v4, 0.0 }
 0x249   :  { %v666_v11 = vmax.f32 %v608_v7, 0.0 }
 0x24a   :  { %v664_v13 = vmax.f32 %v600_v9, 0.0 }
 0x24b   :  { %v703_v14 = vpack.c.bf16 %v666_v11, %v665_v10 }
 0x24c   :  { %v702_v15 = vpack.c.bf16 %v664_v13, %v663_v12  ;;  %v1518_v16 = vpop.f32.mrb[40].mxu1 }
 0x24d   :  { %v621_v17 = vadd.f32 %v1518_v16, %v2032_v59  ;;  %v612_v18 = vpop.f32.mrb[41].mxu1 }
 0x24e   :  { %v613_v19 = vadd.f32 %v2032_v59, %v612_v18  ;;  %v1519_v20 = vpop.f32.mrb[42].mxu1  ;;  %1560 = vmatprep.mubr.bf16.mxu0 %v702_v15 }
 0x24f   :  { %v624_v21 = vadd.f32 %v1519_v20, %v2032_v59  ;;  %v615_v22 = vpop.f32.mrb[43].mxu1  ;;  %1561 = vmatmul.mubr.bf16.gmra.mrb[36].mxu0 %v703_v14  ;;  %v669_v24 = vmax.f32 %v621_v17, 0.0 }
 0x250   :  { %v616_v23 = vadd.f32 %v2032_v59, %v615_v22  ;;  %v667_v26 = vmax.f32 %v613_v19, 0.0 }
 0x251   :  { %v670_v25 = vmax.f32 %v624_v21, 0.0 }
 0x252   :  { %v668_v27 = vmax.f32 %v616_v23, 0.0 }
 0x253   :  { %v705_v28 = vpack.c.bf16 %v670_v25, %v669_v24 }
 0x254   :  { %v704_v29 = vpack.c.bf16 %v668_v27, %v667_v26  ;;  %v1522_v30 = vpop.f32.mrb[44].mxu1 }
 0x255   :  { %v637_v31 = vadd.f32 %v1522_v30, %v2032_v59  ;;  %v628_v32 = vpop.f32.mrb[45].mxu1 }
 0x256   :  { %v629_v33 = vadd.f32 %v2032_v59, %v628_v32  ;;  %v1523_v35 = vpop.f32.mrb[46].mxu1  ;;  %1564 = vmatprep.mubr.bf16.mxu0 %v704_v29 }
 0x257   :  { %v640_v36 = vadd.f32 %v1523_v35, %v2032_v59  ;;  %v631_v38 = vpop.f32.mrb[47].mxu1  ;;  %1565 = vmatmul.mubr.bf16.gmra.mrb[40].mxu0 %v705_v28  ;;  %v673_v40 = vmax.f32 %v637_v31, 0.0 }
 0x258   :  { %v632_v39 = vadd.f32 %v2032_v59, %v631_v38  ;;  %v671_v42 = vmax.f32 %v629_v33, 0.0 }
 0x259   :  { %v674_v41 = vmax.f32 %v640_v36, 0.0 }
 0x25a   :  { %v672_v43 = vmax.f32 %v632_v39, 0.0 }
 0x25b   :  { %v707_v44 = vpack.c.bf16 %v674_v41, %v673_v40 }
 0x25c   :  { %v706_v45 = vpack.c.bf16 %v672_v43, %v671_v42 }
 0x25e   :  { %1568 = vmatprep.mubr.bf16.mxu0 %v706_v45 }
 0x25f   :  { %1569 = vmatmul.mubr.bf16.gmra.mrb[44].mxu0 %v707_v44 }
 0x2fa   :  { %v1542_v49 = vpop.f32.mrb[16].mxu0 }
 0x2fb   :  { %v805_v59 = vadd.f32 %v1542_v49, %v2071_v48  ;;  %v796_v50 = vpop.f32.mrb[17].mxu0 }
 0x2fc   :  { %v797_v51 = vadd.f32 %v2071_v48, %v796_v50  ;;  %v1543_v52 = vpop.f32.mrb[18].mxu0 }
 0x2fd   :  { %v808_v53 = vadd.f32 %v1543_v52, %v2071_v48  ;;  %v799_v54 = vpop.f32.mrb[19].mxu0  ;;  %v2079_v55 = vsel %vm925_vm0, %v805_v59, -1e+30 }
 0x2fe   :  { %v800_v56 = vadd.f32 %v2071_v48, %v799_v54  ;;  %962 = vmax.xlane.f32.xlu1 %v2079_v55  ;;  %v2085_v57 = vsel %vm925_vm0, %v797_v51, -1e+30 }
 0x2ff   :  { %958 = vmax.xlane.f32.xlu0 %v2085_v57  ;;  %v2090_v6 = vsel %vm925_vm0, %v808_v53, -1e+30 }
 0x300   :  { %v2095_v37 = vsel %vm925_vm0, %v800_v56, -1e+30 }
 0x302   :  { %964 = vmax.xlane.f32.xlu1 %v2090_v6  ;;  %v1546_v58 = vpop.f32.mrb[20].mxu0 }
 0x303   :  { %v821_v34 = vadd.f32 %v1546_v58, %v2071_v48  ;;  %v812_v60 = vpop.f32.mrb[21].mxu0  ;;  %960 = vmax.xlane.f32.xlu0 %v2095_v37 }
 0x304   :  { %v1547_v61 = vpop.f32.mrb[22].mxu0  ;;  %v813_v1 = vadd.f32 %v2071_v48, %v812_v60 }
 0x305   :  { %v824_v62 = vadd.f32 %v1547_v61, %v2071_v48  ;;  %v815_v63 = vpop.f32.mrb[23].mxu0  ;;  %v2102_v0 = vsel %vm925_vm0, %v821_v34, -1e+30 }
 0x306   :  { %v816_v2 = vadd.f32 %v2071_v48, %v815_v63  ;;  %v2114_v5 = vsel %vm925_vm0, %v813_v1, -1e+30 }
 0x307   :  { %970 = vmax.xlane.f32.xlu0 %v2102_v0  ;;  %v2109_v3 = vsel %vm925_vm0, %v824_v62, -1e+30 }
 0x308   :  { %972 = vmax.xlane.f32.xlu1 %v2109_v3  ;;  %v2120_v9 = vsel %vm925_vm0, %v816_v2, -1e+30 }
 0x30a   :  { %v1550_v4 = vpop.f32.mrb[24].mxu0 }
 0x30b   :  { %v837_v7 = vadd.f32 %v1550_v4, %v2071_v48  ;;  %v828_v8 = vpop.f32.mrb[25].mxu0  ;;  %966 = vmax.xlane.f32.xlu0 %v2114_v5 }
 0x30c   :  { %v1551_v10 = vpop.f32.mrb[26].mxu0  ;;  %968 = vmax.xlane.f32.xlu1 %v2120_v9  ;;  %v829_v14 = vadd.f32 %v2071_v48, %v828_v8 }
 0x30d   :  { %v840_v11 = vadd.f32 %v1551_v10, %v2071_v48  ;;  %v831_v12 = vpop.f32.mrb[27].mxu0  ;;  %v2126_v13 = vsel %vm925_vm0, %v837_v7, -1e+30 }
 0x30e   :  { %v832_v15 = vadd.f32 %v2071_v48, %v831_v12  ;;  %v2138_v18 = vsel %vm925_vm0, %v829_v14, -1e+30 }
 0x30f   :  { %978 = vmax.xlane.f32.xlu0 %v2126_v13  ;;  %v2133_v16 = vsel %vm925_vm0, %v840_v11, -1e+30 }
 0x310   :  { %980 = vmax.xlane.f32.xlu1 %v2133_v16  ;;  %v2144_v21 = vsel %vm925_vm0, %v832_v15, -1e+30 }
 0x312   :  { %v1554_v17 = vpop.f32.mrb[28].mxu0 }
 0x313   :  { %v853_v19 = vadd.f32 %v1554_v17, %v2071_v48  ;;  %v844_v20 = vpop.f32.mrb[29].mxu0  ;;  %974 = vmax.xlane.f32.xlu0 %v2138_v18 }
 0x314   :  { %v1555_v22 = vpop.f32.mrb[30].mxu0  ;;  %976 = vmax.xlane.f32.xlu1 %v2144_v21  ;;  %v845_v26 = vadd.f32 %v2071_v48, %v844_v20 }
 0x315   :  { %v856_v23 = vadd.f32 %v1555_v22, %v2071_v48  ;;  %v847_v24 = vpop.f32.mrb[31].mxu0  ;;  %v2150_v25 = vsel %vm925_vm0, %v853_v19, -1e+30 }
 0x316   :  { %v848_v27 = vadd.f32 %v2071_v48, %v847_v24  ;;  %v2162_v30 = vsel %vm925_vm0, %v845_v26, -1e+30 }
 0x317   :  { %986 = vmax.xlane.f32.xlu0 %v2150_v25  ;;  %v2157_v28 = vsel %vm925_vm0, %v856_v23, -1e+30 }
 0x318   :  { %988 = vmax.xlane.f32.xlu1 %v2157_v28  ;;  %v2168_v33 = vsel %vm925_vm0, %v848_v27, -1e+30 }
 0x31a   :  { %v1558_v29 = vpop.f32.mrb[32].mxu0 }
 0x31b   :  { %v869_v31 = vadd.f32 %v1558_v29, %v2071_v48  ;;  %v860_v32 = vpop.f32.mrb[33].mxu0  ;;  %982 = vmax.xlane.f32.xlu0 %v2162_v30 }
 0x31c   :  { %v1559_v35 = vpop.f32.mrb[34].mxu0  ;;  %984 = vmax.xlane.f32.xlu1 %v2168_v33  ;;  %v861_v40 = vadd.f32 %v2071_v48, %v860_v32 }
 0x31d   :  { %v872_v36 = vadd.f32 %v1559_v35, %v2071_v48  ;;  %v863_v38 = vpop.f32.mrb[35].mxu0  ;;  %v2174_v39 = vsel %vm925_vm0, %v869_v31, -1e+30 }
 0x31e   :  { %v864_v41 = vadd.f32 %v2071_v48, %v863_v38  ;;  %v2186_v44 = vsel %vm925_vm0, %v861_v40, -1e+30 }
 0x31f   :  { %994 = vmax.xlane.f32.xlu0 %v2174_v39  ;;  %v2181_v42 = vsel %vm925_vm0, %v872_v36, -1e+30 }
 0x320   :  { %996 = vmax.xlane.f32.xlu1 %v2181_v42  ;;  %v2192_v49 = vsel %vm925_vm0, %v864_v41, -1e+30 }
 0x322   :  { %v1562_v43 = vpop.f32.mrb[36].mxu0 }
 0x323   :  { %v885_v45 = vadd.f32 %v1562_v43, %v2071_v48  ;;  %v876_v46 = vpop.f32.mrb[37].mxu0  ;;  %990 = vmax.xlane.f32.xlu0 %v2186_v44 }
 0x324   :  { %v1563_v59 = vpop.f32.mrb[38].mxu0  ;;  %992 = vmax.xlane.f32.xlu1 %v2192_v49  ;;  %v877_v53 = vadd.f32 %v2071_v48, %v876_v46 }
 0x325   :  { %v888_v50 = vadd.f32 %v1563_v59, %v2071_v48  ;;  %v879_v51 = vpop.f32.mrb[39].mxu0  ;;  %v2198_v52 = vsel %vm925_vm0, %v885_v45, -1e+30 }
 0x326   :  { %v880_v54 = vadd.f32 %v2071_v48, %v879_v51  ;;  %v2210_v34 = vsel %vm925_vm0, %v877_v53, -1e+30 }
 0x327   :  { %1002 = vmax.xlane.f32.xlu0 %v2198_v52  ;;  %v2205_v56 = vsel %vm925_vm0, %v888_v50, -1e+30 }
 0x328   :  { %1004 = vmax.xlane.f32.xlu1 %v2205_v56  ;;  %v2216_v62 = vsel %vm925_vm0, %v880_v54, -1e+30 }
 0x32a   :  { %v1566_v58 = vpop.f32.mrb[40].mxu0 }
 0x32b   :  { %v901_v60 = vadd.f32 %v1566_v58, %v2071_v48  ;;  %v892_v61 = vpop.f32.mrb[41].mxu0  ;;  %998 = vmax.xlane.f32.xlu0 %v2210_v34 }
 0x32c   :  { %v1567_v63 = vpop.f32.mrb[42].mxu0  ;;  %1000 = vmax.xlane.f32.xlu1 %v2216_v62  ;;  %v893_v7 = vadd.f32 %v2071_v48, %v892_v61 }
 0x32d   :  { %v904_v1 = vadd.f32 %v1567_v63, %v2071_v48  ;;  %v895_v2 = vpop.f32.mrb[43].mxu0  ;;  %v2222_v4 = vsel %vm925_vm0, %v901_v60, -1e+30 }
 0x32e   :  { %v896_v8 = vadd.f32 %v2071_v48, %v895_v2  ;;  %v2234_v12 = vsel %vm925_vm0, %v893_v7, -1e+30 }
 0x32f   :  { %1010 = vmax.xlane.f32.xlu0 %v2222_v4  ;;  %v2229_v10 = vsel %vm925_vm0, %v904_v1, -1e+30 }
 0x330   :  { %1012 = vmax.xlane.f32.xlu1 %v2229_v10  ;;  %v2239_v15 = vsel %vm925_vm0, %v896_v8, -1e+30 }
 0x332   :  { %v1570_v11 = vpop.f32.mrb[44].mxu0 }
 0x333   :  { %v908_v14 = vpop.f32.mrb[45].mxu0  ;;  %1006 = vmax.xlane.f32.xlu0 %v2234_v12  ;;  %v917_v22 = vadd.f32 %v1570_v11, %v2071_v48 }
 0x334   :  { %v909_v17 = vadd.f32 %v2071_v48, %v908_v14  ;;  %v1571_v19 = vpop.f32.mrb[46].mxu0  ;;  %1008 = vmax.xlane.f32.xlu1 %v2239_v15 }
 0x335   :  { %v911_v20 = vpop.f32.mrb[47].mxu0  ;;  %v920_v26 = vadd.f32 %v1571_v19, %v2071_v48  ;;  %v2258_v29 = vsel %vm925_vm0, %v917_v22, -1e+30 }
 0x336   :  { %v912_v23 = vadd.f32 %v2071_v48, %v911_v20  ;;  %v2247_v24 = vsel %vm925_vm0, %v909_v17, -1e+30 }
 0x337   :  { %1014 = vmax.xlane.f32.xlu0 %v2247_v24  ;;  %v2263_v31 = vsel %vm925_vm0, %v920_v26, -1e+30 }
 0x338   :  { %v2253_v27 = vsel %vm925_vm0, %v912_v23, -1e+30 }
 0x339   :  { %1016 = vmax.xlane.f32.xlu1 %v2253_v27 }
 0x33b   :  { %1018 = vmax.xlane.f32.xlu0 %v2258_v29 }
 0x33d   :  { %1020 = vmax.xlane.f32.xlu1 %v2263_v31 }
 0x38b   :  { %v963_v32 = vpop.xlane.xlu1 %962 }
 0x38c   :  { %v2267_v48 = vsub.f32 %v2079_v55, %v963_v32  ;;  %v959_v35 = vpop.xlane.xlu0 %958 }
 0x38d   :  { %v2270_v36 = vsub.f32 %v2085_v57, %v959_v35 }
 0x38e   :  { %v1058_v38 = vmul.f32 1.442695, %v2267_v48 }
 0x38f   :  { %v1054_v40 = vmul.f32 1.442695, %v2270_v36  ;;  %v965_v41 = vpop.xlane.xlu1 %964 }
 0x390   :  { %1621 = vpow2.f32 %v1058_v38  ;;  %v2275_v47 = vsub.f32 %v2090_v6, %v965_v41  ;;  %v961_v43 = vpop.xlane.xlu0 %960 }
 0x391   :  { %v2278_v45 = vsub.f32 %v2095_v37, %v961_v43  ;;  %1623 = vpow2.f32 %v1054_v40 }
 0x392   :  { %v1060_v55 = vmul.f32 1.442695, %v2275_v47 }
 0x393   :  { %v1056_v57 = vmul.f32 1.442695, %v2278_v45 }
 0x394   :  { %1625 = vpow2.f32 %v1060_v55  ;;  %v971_v46 = vpop.xlane.xlu0 %970 }
 0x395   :  { %v2283_v59 = vsub.f32 %v2102_v0, %v971_v46  ;;  %v973_v50 = vpop.xlane.xlu1 %972  ;;  %1627 = vpow2.f32 %v1056_v57 }
 0x396   :  { %v2286_v51 = vsub.f32 %v2109_v3, %v973_v50 }
 0x397   :  { %v1066_v6 = vmul.f32 1.442695, %v2283_v59 }
 0x398   :  { %v1068_v37 = vmul.f32 1.442695, %v2286_v51  ;;  %v967_v53 = vpop.xlane.xlu0 %966 }
 0x399   :  { %1629 = vpow2.f32 %v1066_v6  ;;  %v2291_v54 = vsub.f32 %v2114_v5, %v967_v53  ;;  %v969_v58 = vpop.xlane.xlu1 %968 }
 0x39a   :  { %v1622_v60 = vpop.eup %1621  ;;  %v2294_v61 = vsub.f32 %v2120_v9, %v969_v58  ;;  %1631 = vpow2.f32 %v1068_v37 }
 0x39b   :  { %v1062_v0 = vmul.f32 1.442695, %v2291_v54  ;;  %1122 = vadd.xlane.f32.xlu0 %v1622_v60  ;;  %v1624_v1 = vpop.eup %1623 }
 0x39c   :  { %v1064_v3 = vmul.f32 1.442695, %v2294_v61  ;;  %v979_v63 = vpop.xlane.xlu0 %978 }
 0x39d   :  { %1633 = vpow2.f32 %v1062_v0  ;;  %v2299_v2 = vsub.f32 %v2126_v13, %v979_v63  ;;  %v981_v7 = vpop.xlane.xlu1 %980 }
 0x39e   :  { %v1626_v5 = vpop.eup %1625  ;;  %v2302_v8 = vsub.f32 %v2133_v16, %v981_v7  ;;  %1635 = vpow2.f32 %v1064_v3 }
 0x39f   :  { %v1074_v9 = vmul.f32 1.442695, %v2299_v2  ;;  %1124 = vadd.xlane.f32.xlu1 %v1626_v5  ;;  %1118 = vadd.xlane.f32.xlu0 %v1624_v1  ;;  %v1628_v13 = vpop.eup %1627 }
 0x3a0   :  { %v1076_v11 = vmul.f32 1.442695, %v2302_v8  ;;  %v975_v14 = vpop.xlane.xlu0 %974 }
 0x3a1   :  { %1637 = vpow2.f32 %v1074_v9  ;;  %v2307_v17 = vsub.f32 %v2138_v18, %v975_v14  ;;  %v977_v19 = vpop.xlane.xlu1 %976 }
 0x3a2   :  { %v2310_v20 = vsub.f32 %v2144_v21, %v977_v19  ;;  %1639 = vpow2.f32 %v1076_v11 }
 0x3a3   :  { %v1630_v22 = vpop.eup %1629  ;;  %v1070_v16 = vmul.f32 1.442695, %v2307_v17  ;;  %1120 = vadd.xlane.f32.xlu1 %v1628_v13 }
 0x3a4   :  { %v1072_v23 = vmul.f32 1.442695, %v2310_v20  ;;  %1130 = vadd.xlane.f32.xlu0 %v1630_v22  ;;  %v987_v26 = vpop.xlane.xlu0 %986  ;;  %v1632_v35 = vpop.eup %1631 }
 0x3a5   :  { %1641 = vpow2.f32 %v1070_v16  ;;  %v2315_v32 = vsub.f32 %v2150_v25, %v987_v26  ;;  %v989_v18 = vpop.xlane.xlu1 %988 }
 0x3a6   :  { %v2318_v38 = vsub.f32 %v2157_v28, %v989_v18  ;;  %1643 = vpow2.f32 %v1072_v23 }
 0x3a7   :  { %v1634_v21 = vpop.eup %1633  ;;  %v1082_v40 = vmul.f32 1.442695, %v2315_v32  ;;  %1132 = vadd.xlane.f32.xlu1 %v1632_v35 }
 0x3a8   :  { %v1084_v41 = vmul.f32 1.442695, %v2318_v38  ;;  %1126 = vadd.xlane.f32.xlu0 %v1634_v21  ;;  %v983_v43 = vpop.xlane.xlu0 %982  ;;  %v1636_v57 = vpop.eup %1635 }
 0x3a9   :  { %1645 = vpow2.f32 %v1082_v40  ;;  %v2323_v55 = vsub.f32 %v2162_v30, %v983_v43  ;;  %v985_v25 = vpop.xlane.xlu1 %984 }
 0x3aa   :  { %v2326_v46 = vsub.f32 %v2168_v33, %v985_v25  ;;  %1647 = vpow2.f32 %v1084_v41 }
 0x3ab   :  { %v1638_v28 = vpop.eup %1637  ;;  %v1078_v50 = vmul.f32 1.442695, %v2323_v55  ;;  %1128 = vadd.xlane.f32.xlu1 %v1636_v57 }
 0x3ac   :  { %v1080_v6 = vmul.f32 1.442695, %v2326_v46  ;;  %1138 = vadd.xlane.f32.xlu0 %v1638_v28  ;;  %v995_v37 = vpop.xlane.xlu0 %994  ;;  %v1640_v58 = vpop.eup %1639 }
 0x3ad   :  { %1649 = vpow2.f32 %v1078_v50  ;;  %v2331_v53 = vsub.f32 %v2174_v39, %v995_v37  ;;  %v997_v30 = vpop.xlane.xlu1 %996 }
 0x3ae   :  { %v2334_v60 = vsub.f32 %v2181_v42, %v997_v30  ;;  %1651 = vpow2.f32 %v1080_v6 }
 0x3af   :  { %v1642_v33 = vpop.eup %1641  ;;  %v1090_v0 = vmul.f32 1.442695, %v2331_v53  ;;  %1140 = vadd.xlane.f32.xlu1 %v1640_v58 }
 0x3b0   :  { %v1092_v3 = vmul.f32 1.442695, %v2334_v60  ;;  %1134 = vadd.xlane.f32.xlu0 %v1642_v33  ;;  %v991_v63 = vpop.xlane.xlu0 %990  ;;  %v1644_v7 = vpop.eup %1643 }
 0x3b1   :  { %1653 = vpow2.f32 %v1090_v0  ;;  %v2339_v1 = vsub.f32 %v2186_v44, %v991_v63  ;;  %v993_v39 = vpop.xlane.xlu1 %992 }
 0x3b2   :  { %v2342_v5 = vsub.f32 %v2192_v49, %v993_v39  ;;  %1655 = vpow2.f32 %v1092_v3 }
 0x3b3   :  { %v1646_v42 = vpop.eup %1645  ;;  %v1086_v9 = vmul.f32 1.442695, %v2339_v1  ;;  %1136 = vadd.xlane.f32.xlu1 %v1644_v7 }
 0x3b4   :  { %v1088_v11 = vmul.f32 1.442695, %v2342_v5  ;;  %1146 = vadd.xlane.f32.xlu0 %v1646_v42  ;;  %v1003_v14 = vpop.xlane.xlu0 %1002  ;;  %v1648_v13 = vpop.eup %1647 }
 0x3b5   :  { %1657 = vpow2.f32 %v1086_v9  ;;  %v2347_v19 = vsub.f32 %v2198_v52, %v1003_v14  ;;  %v1005_v44 = vpop.xlane.xlu1 %1004 }
 0x3b6   :  { %v2350_v22 = vsub.f32 %v2205_v56, %v1005_v44  ;;  %1659 = vpow2.f32 %v1088_v11 }
 0x3b7   :  { %v1650_v49 = vpop.eup %1649  ;;  %v1098_v16 = vmul.f32 1.442695, %v2347_v19  ;;  %1148 = vadd.xlane.f32.xlu1 %v1648_v13 }
 0x3b8   :  { %v1100_v23 = vmul.f32 1.442695, %v2350_v22  ;;  %1142 = vadd.xlane.f32.xlu0 %v1650_v49  ;;  %v999_v26 = vpop.xlane.xlu0 %998  ;;  %v1652_v35 = vpop.eup %1651 }
 0x3b9   :  { %1661 = vpow2.f32 %v1098_v16  ;;  %v2355_v18 = vsub.f32 %v2210_v34, %v999_v26  ;;  %v1001_v52 = vpop.xlane.xlu1 %1000 }
 0x3ba   :  { %v2358_v21 = vsub.f32 %v2216_v62, %v1001_v52  ;;  %1663 = vpow2.f32 %v1100_v23 }
 0x3bb   :  { %v1654_v56 = vpop.eup %1653  ;;  %v1094_v40 = vmul.f32 1.442695, %v2355_v18  ;;  %1144 = vadd.xlane.f32.xlu1 %v1652_v35 }
 0x3bc   :  { %v1096_v41 = vmul.f32 1.442695, %v2358_v21  ;;  %1154 = vadd.xlane.f32.xlu0 %v1654_v56  ;;  %v1011_v43 = vpop.xlane.xlu0 %1010  ;;  %v1656_v57 = vpop.eup %1655 }
 0x3bd   :  { %1665 = vpow2.f32 %v1094_v40  ;;  %v2363_v25 = vsub.f32 %v2222_v4, %v1011_v43  ;;  %v1013_v34 = vpop.xlane.xlu1 %1012 }
 0x3be   :  { %v2366_v28 = vsub.f32 %v2229_v10, %v1013_v34  ;;  %1667 = vpow2.f32 %v1096_v41 }
 0x3bf   :  { %v1658_v62 = vpop.eup %1657  ;;  %v1106_v50 = vmul.f32 1.442695, %v2363_v25  ;;  %1156 = vadd.xlane.f32.xlu1 %v1656_v57 }
 0x3c0   :  { %v1108_v6 = vmul.f32 1.442695, %v2366_v28  ;;  %1150 = vadd.xlane.f32.xlu0 %v1658_v62  ;;  %v1007_v37 = vpop.xlane.xlu0 %1006  ;;  %v1660_v58 = vpop.eup %1659 }
 0x3c1   :  { %1669 = vpow2.f32 %v1106_v50  ;;  %v2371_v30 = vsub.f32 %v2234_v12, %v1007_v37  ;;  %v1009_v4 = vpop.xlane.xlu1 %1008 }
 0x3c2   :  { %v2374_v33 = vsub.f32 %v2239_v15, %v1009_v4  ;;  %1671 = vpow2.f32 %v1108_v6 }
 0x3c3   :  { %v1662_v10 = vpop.eup %1661  ;;  %v1102_v0 = vmul.f32 1.442695, %v2371_v30  ;;  %1152 = vadd.xlane.f32.xlu1 %v1660_v58 }
 0x3c4   :  { %v1104_v3 = vmul.f32 1.442695, %v2374_v33  ;;  %1162 = vadd.xlane.f32.xlu0 %v1662_v10  ;;  %v1015_v63 = vpop.xlane.xlu0 %1014  ;;  %v1664_v12 = vpop.eup %1663 }
 0x3c5   :  { %1673 = vpow2.f32 %v1102_v0  ;;  %v2379_v39 = vsub.f32 %v2247_v24, %v1015_v63 }
 0x3c6   :  { %v1017_v7 = vpop.xlane.xlu1 %1016  ;;  %1675 = vpow2.f32 %v1104_v3 }
 0x3c7   :  { %v1666_v42 = vpop.eup %1665  ;;  %v1110_v9 = vmul.f32 1.442695, %v2379_v39  ;;  %v2383_v15 = vsub.f32 %v2253_v27, %v1017_v7  ;;  %1164 = vadd.xlane.f32.xlu1 %v1664_v12 }
 0x3c8   :  { %1158 = vadd.xlane.f32.xlu0 %v1666_v42  ;;  %v1019_v11 = vpop.xlane.xlu0 %1018  ;;  %v1668_v24 = vpop.eup %1667 }
 0x3c9   :  { %1677 = vpow2.f32 %v1110_v9  ;;  %v1112_v14 = vmul.f32 1.442695, %v2383_v15  ;;  %v2387_v44 = vsub.f32 %v2258_v29, %v1019_v11 }
 0x3ca   :  { %v1021_v13 = vpop.xlane.xlu1 %1020 }
 0x3cb   :  { %v1670_v49 = vpop.eup %1669  ;;  %1679 = vpow2.f32 %v1112_v14  ;;  %v1114_v16 = vmul.f32 1.442695, %v2387_v44  ;;  %v2391_v23 = vsub.f32 %v2263_v31, %v1021_v13  ;;  %1160 = vadd.xlane.f32.xlu1 %v1668_v24 }
 0x3cc   :  { %1170 = vadd.xlane.f32.xlu0 %v1670_v49  ;;  %v1672_v26 = vpop.eup %1671 }
 0x3cd   :  { %1681 = vpow2.f32 %v1114_v16  ;;  %v1116_v27 = vmul.f32 1.442695, %v2391_v23 }
 0x3cf   :  { %v1674_v52 = vpop.eup %1673  ;;  %1683 = vpow2.f32 %v1116_v27  ;;  %1172 = vadd.xlane.f32.xlu1 %v1672_v26 }
 0x3d0   :  { %1166 = vadd.xlane.f32.xlu0 %v1674_v52  ;;  %v1676_v29 = vpop.eup %1675 }
 0x3d3   :  { %v1678_v35 = vpop.eup %1677  ;;  %1168 = vadd.xlane.f32.xlu1 %v1676_v29 }
 0x3d4   :  { %1174 = vadd.xlane.f32.xlu0 %v1678_v35 }
 0x3d5   :  { %v1680_v56 = vpop.eup %1679 }
 0x3d7   :  { %v1682_v40 = vpop.eup %1681  ;;  %1176 = vadd.xlane.f32.xlu1 %v1680_v56 }
 0x3d8   :  { %1178 = vadd.xlane.f32.xlu0 %v1682_v40 }
 0x3d9   :  { %v1684_v31 = vpop.eup %1683 }
 0x3db   :  { %1180 = vadd.xlane.f32.xlu1 %v1684_v31 }
 0x428   :  { %v1123_v41 = vpop.xlane.xlu0 %1122 }
 0x429   :  { %1685 = vlog2.f32 %v1123_v41 }
 0x42c   :  { %v1125_v43 = vpop.xlane.xlu1 %1124  ;;  %v1119_v34 = vpop.xlane.xlu0 %1118 }
 0x42d   :  { %1687 = vlog2.f32 %v1125_v43 }
 0x42e   :  { %1689 = vlog2.f32 %v1119_v34 }
 0x430   :  { %v1121_v57 = vpop.xlane.xlu1 %1120 }
 0x431   :  { %1691 = vlog2.f32 %v1121_v57  ;;  %v1131_v62 = vpop.xlane.xlu0 %1130 }
 0x432   :  { %1693 = vlog2.f32 %v1131_v62 }
 0x433   :  { %v1686_v50 = vpop.eup %1685 }
 0x434   :  { %v1187_v6 = vmul.f32 0.6931472, %v1686_v50  ;;  %v1133_v37 = vpop.xlane.xlu1 %1132 }
 0x435   :  { %1695 = vlog2.f32 %v1133_v37  ;;  %v1127_v4 = vpop.xlane.xlu0 %1126 }
 0x436   :  { %v1248_v58 = vsub.f32 %v2267_v48, %v1187_v6  ;;  %1697 = vlog2.f32 %v1127_v4 }
 0x437   :  { %v1688_v10 = vpop.eup %1687 }
 0x438   :  { %v1690_v0 = vpop.eup %1689  ;;  %1280 = vst [vmem:[#allocation10 + $0x10] sm:$0xff] %v1248_v58  ;;  %v1189_v3 = vmul.f32 0.6931472, %v1688_v10  ;;  %v1129_v63 = vpop.xlane.xlu1 %1128 }
 0x439   :  { %v1183_v12 = vmul.f32 0.6931472, %v1690_v0  ;;  %1699 = vlog2.f32 %v1129_v63  ;;  %v1139_v7 = vpop.xlane.xlu0 %1138 }
 0x43a   :  { %v1249_v42 = vsub.f32 %v2275_v47, %v1189_v3  ;;  %1701 = vlog2.f32 %v1139_v7 }
 0x43b   :  { %v1692_v9 = vpop.eup %1691  ;;  %v1246_v11 = vsub.f32 %v2270_v36, %v1183_v12 }
 0x43c   :  { %v1694_v14 = vpop.eup %1693  ;;  %1281 = vst [vmem:[#allocation10 + $0x18] sm:$0xff] %v1249_v42  ;;  %v1185_v24 = vmul.f32 0.6931472, %v1692_v9  ;;  %v1141_v13 = vpop.xlane.xlu1 %1140 }
 0x43d   :  { %1278 = vst [vmem:[#allocation10] sm:$0xff] %v1246_v11  ;;  %v1195_v48 = vmul.f32 0.6931472, %v1694_v14  ;;  %1703 = vlog2.f32 %v1141_v13  ;;  %v1135_v49 = vpop.xlane.xlu0 %1134 }
 0x43e   :  { %v1247_v16 = vsub.f32 %v2278_v45, %v1185_v24  ;;  %1705 = vlog2.f32 %v1135_v49 }
 0x43f   :  { %v1696_v27 = vpop.eup %1695  ;;  %v1252_v26 = vsub.f32 %v2283_v59, %v1195_v48 }
 0x440   :  { %v1698_v52 = vpop.eup %1697  ;;  %1279 = vst [vmem:[#allocation10 + $0x8] sm:$0xff] %v1247_v16  ;;  %v1197_v47 = vmul.f32 0.6931472, %v1696_v27  ;;  %v1137_v29 = vpop.xlane.xlu1 %1136 }
 0x441   :  { %1284 = vst [vmem:[#allocation10 + $0x30] sm:$0xff] %v1252_v26  ;;  %v1191_v36 = vmul.f32 0.6931472, %v1698_v52  ;;  %1707 = vlog2.f32 %v1137_v29  ;;  %v1147_v35 = vpop.xlane.xlu0 %1146 }
 0x442   :  { %v1253_v56 = vsub.f32 %v2286_v51, %v1197_v47  ;;  %1709 = vlog2.f32 %v1147_v35 }
 0x443   :  { %v1700_v40 = vpop.eup %1699  ;;  %v1250_v31 = vsub.f32 %v2291_v54, %v1191_v36 }
 0x444   :  { %v1702_v41 = vpop.eup %1701  ;;  %1285 = vst [vmem:[#allocation10 + $0x38] sm:$0xff] %v1253_v56  ;;  %v1193_v45 = vmul.f32 0.6931472, %v1700_v40  ;;  %v1149_v43 = vpop.xlane.xlu1 %1148 }
 0x445   :  { %1282 = vst [vmem:[#allocation10 + $0x20] sm:$0xff] %v1250_v31  ;;  %v1203_v59 = vmul.f32 0.6931472, %v1702_v41  ;;  %1711 = vlog2.f32 %v1149_v43  ;;  %v1143_v34 = vpop.xlane.xlu0 %1142 }
 0x446   :  { %v1251_v57 = vsub.f32 %v2294_v61, %v1193_v45  ;;  %1713 = vlog2.f32 %v1143_v34 }
 0x447   :  { %v1704_v62 = vpop.eup %1703  ;;  %v1256_v50 = vsub.f32 %v2299_v2, %v1203_v59 }
 0x448   :  { %v1706_v6 = vpop.eup %1705  ;;  %1283 = vst [vmem:[#allocation10 + $0x28] sm:$0xff] %v1251_v57  ;;  %v1205_v51 = vmul.f32 0.6931472, %v1704_v62  ;;  %v1145_v37 = vpop.xlane.xlu1 %1144 }
 0x449   :  { %1288 = vst [vmem:[#allocation10 + $0x50] sm:$0xff] %v1256_v50  ;;  %v1199_v54 = vmul.f32 0.6931472, %v1706_v6  ;;  %1715 = vlog2.f32 %v1145_v37  ;;  %v1155_v4 = vpop.xlane.xlu0 %1154 }
 0x44a   :  { %v1257_v58 = vsub.f32 %v2302_v8, %v1205_v51  ;;  %1717 = vlog2.f32 %v1155_v4 }
 0x44b   :  { %v1708_v10 = vpop.eup %1707  ;;  %v1254_v0 = vsub.f32 %v2307_v17, %v1199_v54 }
 0x44c   :  { %v1710_v3 = vpop.eup %1709  ;;  %1289 = vst [vmem:[#allocation10 + $0x58] sm:$0xff] %v1257_v58  ;;  %v1201_v61 = vmul.f32 0.6931472, %v1708_v10  ;;  %v1157_v63 = vpop.xlane.xlu1 %1156 }
 0x44d   :  { %1286 = vst [vmem:[#allocation10 + $0x40] sm:$0xff] %v1254_v0  ;;  %v1211_v2 = vmul.f32 0.6931472, %v1710_v3  ;;  %1719 = vlog2.f32 %v1157_v63  ;;  %v1151_v12 = vpop.xlane.xlu0 %1150 }
 0x44e   :  { %v1255_v7 = vsub.f32 %v2310_v20, %v1201_v61  ;;  %1721 = vlog2.f32 %v1151_v12 }
 0x44f   :  { %v1712_v42 = vpop.eup %1711  ;;  %v1260_v9 = vsub.f32 %v2315_v32, %v1211_v2 }
 0x450   :  { %v1714_v11 = vpop.eup %1713  ;;  %1287 = vst [vmem:[#allocation10 + $0x48] sm:$0xff] %v1255_v7  ;;  %v1213_v8 = vmul.f32 0.6931472, %v1712_v42  ;;  %v1153_v14 = vpop.xlane.xlu1 %1152 }
 0x451   :  { %1292 = vst [vmem:[#allocation10 + $0x70] sm:$0xff] %v1260_v9  ;;  %v1207_v17 = vmul.f32 0.6931472, %v1714_v11  ;;  %1723 = vlog2.f32 %v1153_v14  ;;  %v1163_v24 = vpop.xlane.xlu0 %1162 }
 0x452   :  { %v1261_v13 = vsub.f32 %v2318_v38, %v1213_v8  ;;  %1725 = vlog2.f32 %v1163_v24 }
 0x453   :  { %v1716_v48 = vpop.eup %1715  ;;  %v1258_v49 = vsub.f32 %v2323_v55, %v1207_v17 }
 0x454   :  { %v1718_v16 = vpop.eup %1717  ;;  %1293 = vst [vmem:[#allocation10 + $0x78] sm:$0xff] %v1261_v13  ;;  %v1209_v20 = vmul.f32 0.6931472, %v1716_v48  ;;  %v1165_v27 = vpop.xlane.xlu1 %1164 }
 0x455   :  { %1290 = vst [vmem:[#allocation10 + $0x60] sm:$0xff] %v1258_v49  ;;  %v1219_v32 = vmul.f32 0.6931472, %v1718_v16  ;;  %1727 = vlog2.f32 %v1165_v27  ;;  %v1159_v26 = vpop.xlane.xlu0 %1158 }
 0x456   :  { %v1259_v52 = vsub.f32 %v2326_v46, %v1209_v20  ;;  %1729 = vlog2.f32 %v1159_v26 }
 0x457   :  { %v1720_v47 = vpop.eup %1719  ;;  %v1264_v29 = vsub.f32 %v2331_v53, %v1219_v32 }
 0x458   :  { %v1722_v36 = vpop.eup %1721  ;;  %1291 = vst [vmem:[#allocation10 + $0x68] sm:$0xff] %v1259_v52  ;;  %v1221_v38 = vmul.f32 0.6931472, %v1720_v47  ;;  %v1161_v35 = vpop.xlane.xlu1 %1160 }
 0x459   :  { %1296 = vst [vmem:[#allocation10 + $0x90] sm:$0xff] %v1264_v29  ;;  %v1215_v55 = vmul.f32 0.6931472, %v1722_v36  ;;  %1731 = vlog2.f32 %v1161_v35  ;;  %v1171_v56 = vpop.xlane.xlu0 %1170 }
 0x45a   :  { %v1265_v40 = vsub.f32 %v2334_v60, %v1221_v38  ;;  %1733 = vlog2.f32 %v1171_v56 }
 0x45b   :  { %v1724_v31 = vpop.eup %1723  ;;  %v1262_v41 = vsub.f32 %v2339_v1, %v1215_v55 }
 0x45c   :  { %v1726_v45 = vpop.eup %1725  ;;  %1297 = vst [vmem:[#allocation10 + $0x98] sm:$0xff] %v1265_v40  ;;  %v1217_v46 = vmul.f32 0.6931472, %v1724_v31  ;;  %v1173_v43 = vpop.xlane.xlu1 %1172 }
 0x45d   :  { %1294 = vst [vmem:[#allocation10 + $0x80] sm:$0xff] %v1262_v41  ;;  %v1227_v53 = vmul.f32 0.6931472, %v1726_v45  ;;  %1735 = vlog2.f32 %v1173_v43  ;;  %v1167_v59 = vpop.xlane.xlu0 %1166 }
 0x45e   :  { %v1263_v34 = vsub.f32 %v2342_v5, %v1217_v46  ;;  %1737 = vlog2.f32 %v1167_v59 }
 0x45f   :  { %v1728_v57 = vpop.eup %1727  ;;  %v1268_v62 = vsub.f32 %v2347_v19, %v1227_v53 }
 0x460   :  { %v1730_v50 = vpop.eup %1729  ;;  %1295 = vst [vmem:[#allocation10 + $0x88] sm:$0xff] %v1263_v34  ;;  %v1229_v60 = vmul.f32 0.6931472, %v1728_v57  ;;  %v1169_v6 = vpop.xlane.xlu1 %1168 }
 0x461   :  { %1300 = vst [vmem:[#allocation10 + $0xb0] sm:$0xff] %v1268_v62  ;;  %v1223_v1 = vmul.f32 0.6931472, %v1730_v50  ;;  %1739 = vlog2.f32 %v1169_v6  ;;  %v1175_v51 = vpop.xlane.xlu0 %1174 }
 0x462   :  { %v1269_v37 = vsub.f32 %v2350_v22, %v1229_v60  ;;  %1741 = vlog2.f32 %v1175_v51 }
 0x463   :  { %v1732_v54 = vpop.eup %1731  ;;  %v1266_v4 = vsub.f32 %v2355_v18, %v1223_v1 }
 0x464   :  { %v1734_v58 = vpop.eup %1733  ;;  %1301 = vst [vmem:[#allocation10 + $0xb8] sm:$0xff] %v1269_v37  ;;  %v1225_v5 = vmul.f32 0.6931472, %v1732_v54  ;;  %v1177_v10 = vpop.xlane.xlu1 %1176 }
 0x465   :  { %1298 = vst [vmem:[#allocation10 + $0xa0] sm:$0xff] %v1266_v4  ;;  %v1235_v19 = vmul.f32 0.6931472, %v1734_v58  ;;  %1743 = vlog2.f32 %v1177_v10  ;;  %v1179_v0 = vpop.xlane.xlu0 %1178 }
 0x466   :  { %v1267_v3 = vsub.f32 %v2358_v21, %v1225_v5  ;;  %1745 = vlog2.f32 %v1179_v0 }
 0x467   :  { %v1736_v61 = vpop.eup %1735  ;;  %v1272_v63 = vsub.f32 %v2363_v25, %v1235_v19 }
 0x468   :  { %v1738_v2 = vpop.eup %1737  ;;  %1299 = vst [vmem:[#allocation10 + $0xa8] sm:$0xff] %v1267_v3  ;;  %v1237_v22 = vmul.f32 0.6931472, %v1736_v61  ;;  %v1181_v12 = vpop.xlane.xlu1 %1180 }
 0x469   :  { %1304 = vst [vmem:[#allocation10 + $0xd0] sm:$0xff] %v1272_v63  ;;  %v1231_v18 = vmul.f32 0.6931472, %v1738_v2  ;;  %1747 = vlog2.f32 %v1181_v12 }
 0x46a   :  { %v1273_v7 = vsub.f32 %v2366_v28, %v1237_v22 }
 0x46b   :  { %v1740_v42 = vpop.eup %1739  ;;  %v1270_v9 = vsub.f32 %v2371_v30, %v1231_v18 }
 0x46c   :  { %v1742_v11 = vpop.eup %1741  ;;  %1305 = vst [vmem:[#allocation10 + $0xd8] sm:$0xff] %v1273_v7  ;;  %v1233_v8 = vmul.f32 0.6931472, %v1740_v42 }
 0x46d   :  { %1302 = vst [vmem:[#allocation10 + $0xc0] sm:$0xff] %v1270_v9  ;;  %v1239_v21 = vmul.f32 0.6931472, %v1742_v11 }
 0x46e   :  { %v1271_v14 = vsub.f32 %v2374_v33, %v1233_v8 }
 0x46f   :  { %v1744_v25 = vpop.eup %1743  ;;  %v1274_v17 = vsub.f32 %v2379_v39, %v1239_v21 }
 0x470   :  { %v1746_v24 = vpop.eup %1745  ;;  %1303 = vst [vmem:[#allocation10 + $0xc8] sm:$0xff] %v1271_v14  ;;  %v1241_v13 = vmul.f32 0.6931472, %v1744_v25 }
 0x471   :  { %1306 = vst [vmem:[#allocation10 + $0xe0] sm:$0xff] %v1274_v17  ;;  %v1243_v48 = vmul.f32 0.6931472, %v1746_v24 }
 0x472   :  { %v1275_v28 = vsub.f32 %v2383_v15, %v1241_v13 }
 0x473   :  { %v1748_v49 = vpop.eup %1747  ;;  %v1276_v30 = vsub.f32 %v2387_v44, %v1243_v48 }
 0x474   :  { %1307 = vst [vmem:[#allocation10 + $0xe8] sm:$0xff] %v1275_v28  ;;  %v1245_v16 = vmul.f32 0.6931472, %v1748_v49 }
 0x475   :  { %1308 = vst [vmem:[#allocation10 + $0xf0] sm:$0xff] %v1276_v30 }
 0x476   :  { %v1277_v33 = vsub.f32 %v2391_v23, %v1245_v16 }
 0x478   :  { %1309 = vst [vmem:[#allocation10 + $0xf8] sm:$0xff] %v1277_v33 }
 0x479   :  { %1848 = shalt.err (!%p1845_p8)
}
 0x47a   :  { %s1849_s14 = scalar_lea.hbm %s2448_s7, 4096 }
 0x47b   :  { %p1850_p9 = scmp.ne.s32.totalorder %s2448_s7, %s1849_s14  ;;  %p1853_p10 = scmp.lt.u32.totalorder %s1849_s14, %s2448_s7 }
 0x47d   :  { %p1855_p11 = pnand %p1853_p10, %p1850_p9 }
 0x47f   :  { %1858 = shalt.err (!%p1855_p11)
}
 0x480   :  { %1321 = dma.vmem_to_hbm [thread:$0]  %s1316_s8, 4096, %s2448_s7, [#allocation4], %s1871_s1, %s1871_s1, %s1872_s25  }
 0x481   :  { %1865 = dma.done.wait [#allocation4], 4096  }
 0x482   :  { %1866 = vsyncadd [#allocation4], 4294963200 }
 0x483   :  { %1325 = vsyncpa [#allocation3], 1 }
 0x484   :  { %1326 = vsyncpa [#allocation6], 1 }
 0x485   :  { %1327 = vsyncpa [#allocation9], 1 }
 0x486   :  { %1328 = vsyncpa [#allocation4], 1 }

</bundles_post_ra>
